<compile_context>
chip_gen: v7x
topology: tpu7x:2x2x1
jax: 0.10.0
libtpu: 0.0.40
codegen_flags: <defaults>
</compile_context>

<pallas_src>
import functools

import jax
import jax.numpy as jnp
from jax import lax
from jax.experimental import pallas as pl
from jax.experimental.pallas import tpu as pltpu


def _encoder2_kernel(xcol_ref, w1_ref, b1_ref, w2_ref, b2_ref, out_ref,
                     *, H, W, B):
    """Fused conv3x3+ReLU -> conv3x3+ReLU for B folded batch elements.

    xcol_ref : (B*H*W, 9*Cin)   bf16  im2col of the padded input (conv1 LHS)
    w1_ref   : (9*Cin, C1)      bf16  conv1 weights, rows = (kh, kw, cin)
    b1_ref   : (1, C1)          f32
    w2_ref   : (3, 3*C1, C2)    bf16  conv2 weights, [kh][kw*C1 + cin, cout]
    b2_ref   : (1, C2)          f32
    out_ref  : (B*H*W, C2)      f32   lane-dense output
    """
    HW = H * W
    M = B * HW
    C1 = w1_ref.shape[1]

    # ---- conv1: one MXU matmul over all folded batch rows (f32 accumulate),
    #      bias + ReLU in f32.
    h1 = jnp.dot(xcol_ref[...], w1_ref[...], preferred_element_type=jnp.float32)
    h1 = jnp.maximum(h1 + b1_ref[...], 0.0)                     # (M, C1) f32

    # ---- kw taps: +-1 row shifts of the row-major (h, w) flattening, done
    #      once in f32 with pltpu.roll (XLU) + column-boundary masks (VPU).
    #      Wrap-around rows (incl. across folded images) always land on a
    #      masked w boundary, so they are zeroed.
    col = lax.broadcasted_iota(jnp.int32, (M, 1), 0) % W
    left = jnp.where(col == 0, 0.0,
                     pltpu.roll(h1, shift=1, axis=0))           # h1[., w-1]
    right = jnp.where(col == W - 1, 0.0,
                      pltpu.roll(h1, shift=M - 1, axis=0))      # h1[., w+1]

    # ---- single f32->bf16 cast; kw taps become adjacent 64-lane groups.
    lcr = jnp.concatenate([left, h1, right], axis=-1).astype(jnp.bfloat16)

    # ---- kh taps: whole-W-row shifts with zero fill at the image border
    #      (aligned vreg-group moves; W rows = one packed bf16 row group).
    zrows = jnp.zeros((W, 3 * C1), jnp.bfloat16)
    down = jnp.concatenate([zrows, lcr[:M - W]], axis=0)        # h1[h-1, .]
    up = jnp.concatenate([lcr[W:], zrows], axis=0)              # h1[h+1, .]
    if B > 1:
        # Folded batch: zero rows whose h-1 / h+1 neighbour would belong to
        # the previous / next image (kw taps are already handled by the
        # w-boundary masks above).
        hrow = (lax.broadcasted_iota(jnp.int32, (M, 1), 0) % HW) // W
        down = jnp.where(hrow == 0, jnp.zeros_like(down), down)
        up = jnp.where(hrow == H - 1, jnp.zeros_like(up), up)

    # ---- conv2: three accumulated MXU matmuls (one per kh), K = 3*C1 = 192,
    #      f32 accumulation, bias + ReLU, lane-dense (M, 128) f32 store.
    acc = jnp.dot(down, w2_ref[0], preferred_element_type=jnp.float32)
    acc = acc + jnp.dot(lcr, w2_ref[1], preferred_element_type=jnp.float32)
    acc = acc + jnp.dot(up, w2_ref[2], preferred_element_type=jnp.float32)
    out_ref[...] = jnp.maximum(acc + b2_ref[...], 0.0).astype(out_ref.dtype)


def encoder2_pallas(x_col, w1, b1, w2, b2, *, H, W, N, num_grid_steps=None):
    """pallas_call wrapper: batch folded into M, small parallel grid."""
    HW = H * W
    M_total, K1 = x_col.shape
    assert M_total == N * HW
    C1 = w1.shape[1]
    C2 = w2.shape[-1]

    if num_grid_steps is None:
        # 2 parallel steps keep both v7x TensorCores busy; the rest of the
        # batch is folded into M (amortizes per-step overhead; v5e/v6e have a
        # single TC so the one extra tiny step at N=2 is negligible).
        num_grid_steps = 2 if (N >= 2 and N % 2 == 0) else 1
    assert N % num_grid_steps == 0
    B = N // num_grid_steps
    Mb = B * HW

    # TODO(synk): for much larger H*W, tile H with a 2-row halo and raise
    # vmem_limit_bytes (v7x has only 64 MiB physical VMEM); at 16x16 the whole
    # fused working set fits comfortably in the default scoped VMEM.

    kernel = functools.partial(_encoder2_kernel, H=H, W=W, B=B)
    return pl.pallas_call(
        kernel,
        out_shape=jax.ShapeDtypeStruct((M_total, C2), jnp.float32),
        grid_spec=pltpu.PrefetchScalarGridSpec(
            num_scalar_prefetch=0,
            grid=(num_grid_steps,),
            in_specs=[
                pl.BlockSpec((Mb, K1), lambda n: (n, 0)),            # x_col
                pl.BlockSpec((K1, C1), lambda n: (0, 0)),            # w1 slab
                pl.BlockSpec((1, C1), lambda n: (0, 0)),             # b1
                pl.BlockSpec((3, 3 * C1, C2), lambda n: (0, 0, 0)),  # w2 slabs
                pl.BlockSpec((1, C2), lambda n: (0, 0)),             # b2
            ],
            out_specs=pl.BlockSpec((Mb, C2), lambda n: (n, 0)),
        ),
        compiler_params=pltpu.CompilerParams(
            dimension_semantics=("parallel",)),
    )(x_col, w1, b1, w2, b2)


def init_encoder2_params(key):
    """Deterministic params with PyTorch Conv2d shapes: (Cout, Cin, 3, 3)."""
    k1, k2, k3, k4 = jax.random.split(key, 4)
    w1 = jax.random.normal(k1, (64, 3, 3, 3), jnp.float32) * 0.1
    b1 = jax.random.normal(k2, (64,), jnp.float32) * 0.1
    w2 = jax.random.normal(k3, (128, 64, 3, 3), jnp.float32) * 0.05
    b2 = jax.random.normal(k4, (128,), jnp.float32) * 0.05
    return {"w1": w1, "b1": b1, "w2": w2, "b2": b2}


@jax.jit
def encoder2_forward(x_nchw, params):
    """Matches Encoder2.forward: relu(conv2(relu(conv1(x)))), NCHW in/out."""
    N, Cin, H, W = x_nchw.shape
    C1 = params["w1"].shape[0]
    C2 = params["w2"].shape[0]

    # NCHW -> NHWC, then im2col of the tiny Cin=3 input in plain JAX (the
    # slab is only N*H*W*27 bf16 elements; the 64/128-channel intermediates
    # never leave VMEM inside the fused kernel).
    x = jnp.transpose(x_nchw, (0, 2, 3, 1))
    x_pad = jnp.pad(x, ((0, 0), (1, 1), (1, 1), (0, 0)))
    patches = [x_pad[:, kh:kh + H, kw:kw + W, :]
               for kh in range(3) for kw in range(3)]
    x_col = jnp.concatenate(patches, axis=-1).reshape(N * H * W, 9 * Cin)
    x_col = x_col.astype(jnp.bfloat16)

    # OIHW -> (kh, kw, Cin, Cout); conv1 as a flat (27, C1) slab, conv2 as
    # three per-kh (3*C1, C2) slabs (bf16 MXU operands, f32 biases).
    w1 = jnp.transpose(params["w1"], (2, 3, 1, 0)).reshape(9 * Cin, C1)
    w2 = jnp.transpose(params["w2"], (2, 3, 1, 0)).reshape(3, 3 * C1, C2)
    w1 = w1.astype(jnp.bfloat16)
    w2 = w2.astype(jnp.bfloat16)
    b1 = params["b1"].reshape(1, C1).astype(jnp.float32)
    b2 = params["b2"].reshape(1, C2).astype(jnp.float32)

    out = encoder2_pallas(x_col, w1, b1, w2, b2, H=H, W=W, N=N)  # (N*H*W, C2)
    return jnp.transpose(out.reshape(N, H, W, C2), (0, 3, 1, 2))


def _reference_forward(x_nchw, params):
    """Pure-JAX reference (lax.conv) on the same bf16-rounded operands."""
    def r(a):  # round to bf16 like the kernel's MXU operands
        return a.astype(jnp.bfloat16).astype(jnp.float32)

    def conv(x, w, b):
        y = lax.conv_general_dilated(
            r(x), r(w), window_strides=(1, 1), padding="SAME",
            dimension_numbers=("NCHW", "OIHW", "NCHW"),
            precision=lax.Precision.HIGHEST)
        return jax.nn.relu(y + b[None, :, None, None])

    h = conv(x_nchw, params["w1"], params["b1"])
    return conv(h, params["w2"], params["b2"])


if __name__ == "__main__":
    key = jax.random.PRNGKey(0)
    pkey, xkey = jax.random.split(key)

    params = init_encoder2_params(pkey)
    # Small input consistent with Conv2d(3, 64, ...): N=2, C=3, H=W=16.
    x = jax.random.normal(xkey, (2, 3, 16, 16), jnp.float32)

    out = jax.block_until_ready(encoder2_forward(x, params))
    assert out.shape == (2, 128, 16, 16), out.shape

    ref = jax.block_until_ready(_reference_forward(x, params))
    # bf16 MXU operands with f32 accumulation -> compare against a reference
    # computed on the same bf16-rounded inputs; tolerance covers accumulation
    # order differences only.
    assert jnp.allclose(out, ref, atol=2e-2, rtol=2e-2), (
        float(jnp.max(jnp.abs(out - ref))))

    print("KERNEL_OK")
</pallas_src>

<mosaic_0001>
module attributes {stable_mosaic.version = 11 : i64} {
  func.func @_encoder2_kernel(%arg0: i32, %arg1: memref<256x27xbf16, #tpu.memory_space<vmem>>, %arg2: memref<27x64xbf16, #tpu.memory_space<vmem>>, %arg3: memref<1x64xf32, #tpu.memory_space<vmem>>, %arg4: memref<3x192x128xbf16, #tpu.memory_space<vmem>>, %arg5: memref<1x128xf32, #tpu.memory_space<vmem>>, %arg6: memref<256x128xf32, #tpu.memory_space<vmem>>) attributes {dimension_semantics = [#tpu.dimension_semantics<parallel>], iteration_bounds = array<i64: 2>, scalar_prefetch = 0 : i64, scratch_operands = 0 : i64, tpu.core_type = #tpu.core_type<tc>, window_params = [{transform_indices = @transform_0, window_bounds = array<i64: 256, 27>}, {pipeline_mode = #tpu.pipeline_mode<synchronous>, transform_indices = @transform_1, window_bounds = array<i64: 27, 64>}, {pipeline_mode = #tpu.pipeline_mode<synchronous>, transform_indices = @transform_2, window_bounds = array<i64: 1, 64>}, {pipeline_mode = #tpu.pipeline_mode<synchronous>, transform_indices = @transform_3, window_bounds = array<i64: 3, 192, 128>}, {pipeline_mode = #tpu.pipeline_mode<synchronous>, transform_indices = @transform_4, window_bounds = array<i64: 1, 128>}, {transform_indices = @transform_5, window_bounds = array<i64: 256, 128>}]} {
    %c0 = arith.constant 0 : index
    %c0_0 = arith.constant 0 : index
    %0 = vector.load %arg1[%c0, %c0_0] : memref<256x27xbf16, #tpu.memory_space<vmem>>, vector<256x27xbf16>
    %c0_1 = arith.constant 0 : index
    %c0_2 = arith.constant 0 : index
    %1 = vector.load %arg2[%c0_1, %c0_2] : memref<27x64xbf16, #tpu.memory_space<vmem>>, vector<27x64xbf16>
    %cst = arith.constant dense<0.000000e+00> : vector<256x64xf32>
    %2 = tpu.matmul %0, %1, %cst {dimension_numbers = #tpu.dot_dimension_numbers<[1], [0], [0], [1], [0, 0, 1, 1], [], []>} : vector<256x27xbf16>, vector<27x64xbf16>, vector<256x64xf32> -> vector<256x64xf32>
    %c0_3 = arith.constant 0 : index
    %c0_4 = arith.constant 0 : index
    %3 = vector.load %arg3[%c0_3, %c0_4] : memref<1x64xf32, #tpu.memory_space<vmem>>, vector<1x64xf32>
    %4 = vector.broadcast %3 : vector<1x64xf32> to vector<256x64xf32>
    %5 = arith.addf %2, %4 : vector<256x64xf32>
    %cst_5 = arith.constant 0.000000e+00 : f32
    %6 = vector.broadcast %cst_5 : f32 to vector<256x64xf32>
    %7 = arith.maximumf %5, %6 : vector<256x64xf32>
    %8 = tpu.iota {dimensions = array<i32: 0>} : vector<256x1xi32>
    %c16_i32 = arith.constant 16 : i32
    %c0_i32 = arith.constant 0 : i32
    %9 = arith.cmpi eq, %c16_i32, %c0_i32 : i32
    %c1_i32 = arith.constant 1 : i32
    %10 = arith.select %9, %c1_i32, %c16_i32 : i32
    %11 = vector.broadcast %10 : i32 to vector<256x1xi32>
    %12 = arith.remsi %8, %11 : vector<256x1xi32>
    %c0_i32_6 = arith.constant 0 : i32
    %13 = vector.broadcast %c0_i32_6 : i32 to vector<256x1xi32>
    %14 = arith.cmpi ne, %12, %13 : vector<256x1xi32>
    %c0_i32_7 = arith.constant 0 : i32
    %15 = vector.broadcast %c0_i32_7 : i32 to vector<256x1xi32>
    %16 = arith.cmpi slt, %12, %15 : vector<256x1xi32>
    %c0_i32_8 = arith.constant 0 : i32
    %17 = arith.cmpi slt, %10, %c0_i32_8 : i32
    %18 = vector.broadcast %17 : i1 to vector<256x1xi1>
    %19 = vector.broadcast %18 : vector<256x1xi1> to vector<256x1xi1>
    %20 = arith.xori %16, %19 : vector<256x1xi1>
    %21 = arith.andi %20, %14 : vector<256x1xi1>
    %22 = vector.broadcast %10 : i32 to vector<256x1xi32>
    %23 = arith.addi %12, %22 : vector<256x1xi32>
    %24 = arith.select %21, %23, %12 : vector<256x1xi1>, vector<256x1xi32>
    %c0_i32_9 = arith.constant 0 : i32
    %25 = vector.broadcast %c0_i32_9 : i32 to vector<256x1xi32>
    %26 = arith.cmpi eq, %24, %25 : vector<256x1xi32>
    %c1_i32_10 = arith.constant 1 : i32
    %27 = tpu.dynamic_rotate %7 by %c1_i32_10 dim 0 : vector<256x64xf32>, i32 -> vector<256x64xf32>
    %cst_11 = arith.constant 0.000000e+00 : f32
    %28 = vector.shape_cast %26 : vector<256x1xi1> to vector<256x1xi1>
    %29 = vector.broadcast %28 : vector<256x1xi1> to vector<256x64xi1>
    %30 = vector.broadcast %cst_11 : f32 to vector<256x64xf32>
    %31 = arith.select %29, %30, %27 : vector<256x64xi1>, vector<256x64xf32>
    %c15_i32 = arith.constant 15 : i32
    %32 = vector.broadcast %c15_i32 : i32 to vector<256x1xi32>
    %33 = arith.cmpi eq, %24, %32 : vector<256x1xi32>
    %c255_i32 = arith.constant 255 : i32
    %34 = tpu.dynamic_rotate %7 by %c255_i32 dim 0 : vector<256x64xf32>, i32 -> vector<256x64xf32>
    %cst_12 = arith.constant 0.000000e+00 : f32
    %35 = vector.shape_cast %33 : vector<256x1xi1> to vector<256x1xi1>
    %36 = vector.broadcast %35 : vector<256x1xi1> to vector<256x64xi1>
    %37 = vector.broadcast %cst_12 : f32 to vector<256x64xf32>
    %38 = arith.select %36, %37, %34 : vector<256x64xi1>, vector<256x64xf32>
    %39 = tpu.concatenate %31, %7, %38 in 1 : vector<256x64xf32>, vector<256x64xf32>, vector<256x64xf32> -> vector<256x192xf32>
    %40 = arith.truncf %39 : vector<256x192xf32> to vector<256x192xbf16>
    %cst_13 = arith.constant 0.000000e+00 : bf16
    %41 = vector.broadcast %cst_13 : bf16 to vector<16x192xbf16>
    %42 = vector.extract_strided_slice %40 {offsets = [0, 0], sizes = [240, 192], strides = [1, 1]} : vector<256x192xbf16> to vector<240x192xbf16>
    %43 = tpu.concatenate %41, %42 in 0 : vector<16x192xbf16>, vector<240x192xbf16> -> vector<256x192xbf16>
    %44 = vector.extract_strided_slice %40 {offsets = [16, 0], sizes = [240, 192], strides = [1, 1]} : vector<256x192xbf16> to vector<240x192xbf16>
    %45 = tpu.concatenate %44, %41 in 0 : vector<240x192xbf16>, vector<16x192xbf16> -> vector<256x192xbf16>
    %c0_14 = arith.constant 0 : index
    %c0_15 = arith.constant 0 : index
    %c0_16 = arith.constant 0 : index
    %46 = vector.load %arg4[%c0_14, %c0_15, %c0_16] : memref<3x192x128xbf16, #tpu.memory_space<vmem>>, vector<1x192x128xbf16>
    %47 = vector.shape_cast %46 : vector<1x192x128xbf16> to vector<192x128xbf16>
    %cst_17 = arith.constant dense<0.000000e+00> : vector<256x128xf32>
    %48 = tpu.matmul %43, %47, %cst_17 {dimension_numbers = #tpu.dot_dimension_numbers<[1], [0], [0], [1], [0, 0, 1, 1], [], []>} : vector<256x192xbf16>, vector<192x128xbf16>, vector<256x128xf32> -> vector<256x128xf32>
    %c1 = arith.constant 1 : index
    %c0_18 = arith.constant 0 : index
    %c0_19 = arith.constant 0 : index
    %49 = vector.load %arg4[%c1, %c0_18, %c0_19] : memref<3x192x128xbf16, #tpu.memory_space<vmem>>, vector<1x192x128xbf16>
    %50 = vector.shape_cast %49 : vector<1x192x128xbf16> to vector<192x128xbf16>
    %cst_20 = arith.constant dense<0.000000e+00> : vector<256x128xf32>
    %51 = tpu.matmul %40, %50, %cst_20 {dimension_numbers = #tpu.dot_dimension_numbers<[1], [0], [0], [1], [0, 0, 1, 1], [], []>} : vector<256x192xbf16>, vector<192x128xbf16>, vector<256x128xf32> -> vector<256x128xf32>
    %52 = arith.addf %48, %51 : vector<256x128xf32>
    %c2 = arith.constant 2 : index
    %c0_21 = arith.constant 0 : index
    %c0_22 = arith.constant 0 : index
    %53 = vector.load %arg4[%c2, %c0_21, %c0_22] : memref<3x192x128xbf16, #tpu.memory_space<vmem>>, vector<1x192x128xbf16>
    %54 = vector.shape_cast %53 : vector<1x192x128xbf16> to vector<192x128xbf16>
    %cst_23 = arith.constant dense<0.000000e+00> : vector<256x128xf32>
    %55 = tpu.matmul %45, %54, %cst_23 {dimension_numbers = #tpu.dot_dimension_numbers<[1], [0], [0], [1], [0, 0, 1, 1], [], []>} : vector<256x192xbf16>, vector<192x128xbf16>, vector<256x128xf32> -> vector<256x128xf32>
    %56 = arith.addf %52, %55 : vector<256x128xf32>
    %c0_24 = arith.constant 0 : index
    %c0_25 = arith.constant 0 : index
    %57 = vector.load %arg5[%c0_24, %c0_25] : memref<1x128xf32, #tpu.memory_space<vmem>>, vector<1x128xf32>
    %58 = vector.broadcast %57 : vector<1x128xf32> to vector<256x128xf32>
    %59 = arith.addf %56, %58 : vector<256x128xf32>
    %cst_26 = arith.constant 0.000000e+00 : f32
    %60 = vector.broadcast %cst_26 : f32 to vector<256x128xf32>
    %61 = arith.maximumf %59, %60 : vector<256x128xf32>
    %c0_27 = arith.constant 0 : index
    %c0_28 = arith.constant 0 : index
    %62 = vector.load %arg6[%c0_27, %c0_28] : memref<256x128xf32, #tpu.memory_space<vmem>>, vector<256x128xf32>
    tpu.vector_store %arg6[%c0_27, %c0_28], %61 {strides = array<i32>} : memref<256x128xf32, #tpu.memory_space<vmem>>, vector<256x128xf32>,
    return
  }
  func.func @transform_0(%arg0: i32) -> (i32, i32) {
    %c0_i32 = arith.constant 0 : i32
    %c0_i32_0 = arith.constant 0 : i32
    return %arg0, %c0_i32 : i32, i32
  }
  func.func @transform_1(%arg0: i32) -> (i32, i32) {
    %c0_i32 = arith.constant 0 : i32
    %c0_i32_0 = arith.constant 0 : i32
    %c0_i32_1 = arith.constant 0 : i32
    return %c0_i32, %c0_i32_0 : i32, i32
  }
  func.func @transform_2(%arg0: i32) -> (i32, i32) {
    %c0_i32 = arith.constant 0 : i32
    %c0_i32_0 = arith.constant 0 : i32
    %c0_i32_1 = arith.constant 0 : i32
    return %c0_i32, %c0_i32_0 : i32, i32
  }
  func.func @transform_3(%arg0: i32) -> (i32, i32, i32) {
    %c0_i32 = arith.constant 0 : i32
    %c0_i32_0 = arith.constant 0 : i32
    %c0_i32_1 = arith.constant 0 : i32
    %c0_i32_2 = arith.constant 0 : i32
    return %c0_i32, %c0_i32_0, %c0_i32_1 : i32, i32, i32
  }
  func.func @transform_4(%arg0: i32) -> (i32, i32) {
    %c0_i32 = arith.constant 0 : i32
    %c0_i32_0 = arith.constant 0 : i32
    %c0_i32_1 = arith.constant 0 : i32
    return %c0_i32, %c0_i32_0 : i32, i32
  }
  func.func @transform_5(%arg0: i32) -> (i32, i32) {
    %c0_i32 = arith.constant 0 : i32
    %c0_i32_0 = arith.constant 0 : i32
    return %arg0, %c0_i32 : i32, i32
  }
}

</mosaic_0001>

<bundles_post_ra>
// kernel: encoder2_forward.1
= control target key start
LH: loop header
LB: loop body
LE: loop exit
PB: predicated region body
PF: predicated region fallthrough
CT: control target
= control target key end

     0   :  { %10 = vsyncpa [#allocation3], 0  ;;  %s4538_s0 = inlined_call_operand.vmem [shape: bf16[512,27], index: 0, kind: input, shape index: {}]   ;;  %s4539_s1 = inlined_call_operand.vmem [shape: bf16[27,64], index: 1, kind: input, shape index: {}]   ;;  %s4540_s2 = inlined_call_operand.vmem [shape: f32[1,64], index: 2, kind: input, shape index: {}]   ;;  %s4541_s3 = inlined_call_operand.vmem [shape: bf16[3,192,128], index: 3, kind: input, shape index: {}]   ;;  %s4542_s4 = inlined_call_operand.vmem [shape: f32[1,128], index: 4, kind: input, shape index: {}]   ;;  %s4543_s5 = inlined_call_operand.hbm [shape: f32[512,128], index: 5, kind: output, shape index: {}]  }
   0x1   :  { %12 = vsyncpa [#allocation3 + $0x1], 0  ;;  %s3176_s18 = smov 0   ;;  %s3178_s19 = smov 0  }
   0x2   :  { %s3180_s20 = smov 0   ;;  %s3182_s21 = smov 0  }
   0x3 LB: > { %s3197_s22 = sadd.s32 4294967295, %s3138_s21   ;;  %s2641_s23 = sadd.s32 4294967294, %s3138_s21   ;;  %s3138_s21 = sphi %s3182_s21, %s4655_s21   ;;  %s3134_s20 = sphi %s3180_s20, %s4654_s20   ;;  %s3130_s19 = sphi %s3178_s19, %s4653_s19   ;;  %s3126_s18 = sphi %s3176_s18, %s4652_s18  }
   0x4   : > { %s3201_s24 = sadd.s32 1, %s3138_s21   ;;  %s135_s25 = sadd.s32 1, %s3134_s20 }
   0x5   : > { %s132_s26 = ssub.s32 %s3138_s21, %s3201_s24  ;;  %p145_p0 = scmp.ne.s32.totalorder %s3134_s20, %s3130_s19 }
   0x6   : > { %p133_p1 = scmp.eq.s32.totalorder %s132_s26, 0  ;;  %p146_p2 = scmp.eq.s32.totalorder %s3197_s22, 1 }
   0x7   : > { %p151_p3 = scmp.ne.s32.totalorder %s3130_s19, %s3126_s18  ;;  %p152_p4 = scmp.eq.s32.totalorder %s2641_s23, 1 }
   0x8   : > { %s3212_s27 = scalar_select %p133_p1, %s3134_s20, %s135_s25  }
   0x9   : > { %p3214_p5 = por %p146_p2, %p145_p0  ;;  %p3218_p6 = por %p152_p4, %p151_p3 }
   0xa   : > { %p2644_p7 = scmp.ge.s32.totalorder %s3138_s21, 1  ;;  %p191_p8 = scmp.lt.s32.totalorder %s3138_s21, 3 }
   0xc   : > { %p192_p9 = pnand %p2644_p7, %p191_p8 }
   0xe   : > { %195 = sbr.rel (%p192_p9) target bundleno = 832 (0x340), region = 40 }
  0x15   : > { %v3022_v0 = vld [vmem:[%s4539_s1] sm:$0xff]   ;;  %vm410_vm0 = vcmask 1044480   ;;  %v3023_v1 = vld [vmem:[%s4539_s1 + $0x8] sm:$0x3f]   ;;  %vm411_vm1 = vcmask 1045504   ;;  %s2646_s9 = sshll.u32 %s3197_s22, 5  ;;  %v610_v34 = vlaneseq }
  0x16   : > { %2838 = vmatprep.subr.bf16.mxu0 %v3022_v0  ;;  %v3140_v2 = vmov 65535   ;;  %p220_p10 = scmp.lt.s32.totalorder %s2646_s9, 63  ;;  %vm361_vm2 = vcmask 220160   ;;  %v3040_v22 = vld [vmem:[%s4541_s3 + $0x60] sm:$0xff]   ;;  %v4546_v23 = vmov 0   ;;  %v3041_v24 = vld [vmem:[%s4541_s3 + $0x68] sm:$0xff]  }
  0x17   : > { %2839 = vmatpush3.bf16.msra.mxu0 %v3022_v0  ;;  %v412_v3 = vsel %vm410_vm0, 4294967295, %v3140_v2  ;;  %2874 = vmatprep.subr.bf16.mxu1 %v4546_v23  ;;  %v3042_v25 = vld [vmem:[%s4541_s3 + $0x70] sm:$0xff]   ;;  %v3043_v26 = vld [vmem:[%s4541_s3 + $0x78] sm:$0xff]   ;;  %v3044_v27 = vld [vmem:[%s4541_s3 + $0x80] sm:$0xff]   ;;  %v3325_v35 = vshrl.u32 %v610_v34, 7  ;;  %vm1541_vm6 = vcmask 523264  }
  0x18   : > { %v413_v4 = vsel %vm411_vm1, %v412_v3, 0  ;;  %s4657_s9 = smov (!%p220_p10, %s2646_s9), 63  ;;  %2886 = vmatpush1.bf16.msra.mxu1 %v3040_v22  ;;  %v3045_v28 = vld [vmem:[%s4541_s3 + $0x88] sm:$0xff]   ;;  %v3046_v29 = vld [vmem:[%s4541_s3 + $0x90] sm:$0xff]   ;;  %v3047_v30 = vld [vmem:[%s4541_s3 + $0x98] sm:$0xff]   ;;  %s3142_s8 = smov 64  }
  0x19   : > { %v415_v5 = vand.u32 %v3023_v1, %v413_v4  ;;  %s2647_s10 = sshll.u32 %s4657_s9, 2  ;;  %2875 = vmatprep.subr.bf16.mxu1 %v4546_v23  ;;  %v3048_v31 = vld [vmem:[%s4541_s3 + $0xa0] sm:$0xff]   ;;  %v3049_v32 = vld [vmem:[%s4541_s3 + $0xa8] sm:$0xff]   ;;  %v3050_v33 = vld [vmem:[%s4541_s3 + $0xb0] sm:$0xff]   ;;  %v612_v36 = vadd.s32 8, %v3325_v35  ;;  %v614_v39 = vadd.s32 24, %v3325_v35 }
  0x1a   : > { %s3234_s13 = scalar_lea.vmem %s4538_s0, %s2647_s10  ;;  %v3331_v37 = vld [vmem:[%s4540_s2] ss:$0 sm:$0xff]  ;;  %v616_v40 = vadd.s32 40, %v3325_v35  ;;  %v3336_v41 = vadd.s32 56, %v3325_v35  ;;  %v3339_v43 = vadd.s32 104, %v3325_v35  ;;  %v3342_v44 = vadd.s32 72, %v3325_v35 }
  0x1b   : > { %2840 = vmatprep.subr.bf16.mxu0 %v415_v5  ;;  %v3024_v6 = vld [vmem:[%s3234_s13] sm:$0xff]   ;;  %v3025_v7 = vld [vmem:[%s3234_s13 + $0x8] sm:$0xff]   ;;  %v3026_v8 = vld [vmem:[%s3234_s13 + $0x10] sm:$0xff]   ;;  %v654_v38 = vand.u32 15, %v612_v36  ;;  %vm1284_vm3 = vcmp.lt.s32.totalorder %v3325_v35, 7  ;;  %v3347_v47 = vadd.s32 120, %v3325_v35 }
  0x1c   : > { %2841 = vmatpush3.bf16.msra.mxu0 %v415_v5  ;;  %2842 = vmatprep.mubr.msk.bf16.mxu0 %vm361_vm2, %v3024_v6  ;;  %v3027_v9 = vld [vmem:[%s3234_s13 + $0x18] sm:$0xff]   ;;  %v3028_v10 = vld [vmem:[%s3234_s13 + $0x20] sm:$0xff]   ;;  %v3029_v11 = vld [vmem:[%s3234_s13 + $0x28] sm:$0xff]   ;;  %v3350_v48 = vadd.s32 88, %v3325_v35  ;;  %vm1091_vm5 = vcmp.lt.s32.totalorder %v3325_v35, 1  ;;  %v668_v52 = vand.u32 15, %v614_v39 }
  0x1d   : > { %v3030_v12 = vld [vmem:[%s3234_s13 + $0x30] sm:$0xff]   ;;  %v3031_v13 = vld [vmem:[%s3234_s13 + $0x38] sm:$0xff]   ;;  %v3032_v14 = vld [vmem:[%s3234_s13 + $0x40] sm:$0xff]   ;;  %1775 = vmatprep.subr.bf16.mxu0 %v4546_v23  ;;  %2887 = vmatpush1.bf16.msra.mxu1 %v3041_v24  ;;  %vm3353_vm4 = vcmp.eq.s32.totalorder %v654_v38, 15  ;;  %v682_v56 = vand.u32 15, %v616_v40  ;;  %v696_v57 = vand.u32 15, %v3336_v41 }
  0x1e   : > { %v3033_v15 = vld [vmem:[%s3234_s13 + $0x48] sm:$0xff]   ;;  %v3034_v16 = vld [vmem:[%s3234_s13 + $0x50] sm:$0xff]   ;;  %v3035_v17 = vld [vmem:[%s3234_s13 + $0x58] sm:$0xff]   ;;  %2876 = vmatprep.subr.bf16.mxu1 %v4546_v23  ;;  %v738_v60 = vand.u32 15, %v3339_v43  ;;  %v710_v61 = vand.u32 15, %v3342_v44  ;;  %v752_v63 = vand.u32 15, %v3347_v47 }
  0x1f   : > { %2843 = vmatmul.mubr.msk.bf16.vlgmr.msra.gmra.mrb[0].mxu0 %vm361_vm2, %v3025_v7  ;;  %v3036_v18 = vld [vmem:[%s3234_s13 + $0x60] sm:$0xff]   ;;  %v3037_v19 = vld [vmem:[%s3234_s13 + $0x68] sm:$0xff]   ;;  %v3038_v20 = vld [vmem:[%s3234_s13 + $0x70] sm:$0xff]   ;;  %v3371_v0 = vadd.s32 136, %v3325_v35  ;;  %v724_v1 = vand.u32 15, %v3350_v48  ;;  %vm3378_vm7 = vcmp.eq.s32.totalorder %v668_v52, 15 }
  0x20   : > { %2846 = vmatprep.mubr.msk.bf16.mxu0 %vm361_vm2, %v3026_v8  ;;  %v3039_v21 = vld [vmem:[%s3234_s13 + $0x78] sm:$0xff]   ;;  %1776 = vmatpush1.bf16.msra.mxu0 %v3040_v22  ;;  %v3383_v6 = vadd.s32 152, %v3325_v35  ;;  %vm3395_vm8 = vcmp.eq.s32.totalorder %v682_v56, 15  ;;  %vm3451_vm9 = vcmp.eq.s32.totalorder %v696_v57, 15  ;;  %vm3466_vm10 = vcmp.eq.s32.totalorder %v710_v61, 15  ;;  %s216_s9 = sand.u32 1, %s3130_s19  }
  0x21   : > { %1777 = vmatprep.subr.bf16.mxu0 %v4546_v23  ;;  %2888 = vmatpush1.bf16.msra.mxu1 %v3042_v25  ;;  %v766_v38 = vand.u32 15, %v3371_v0  ;;  %vm3531_vm11 = vcmp.eq.s32.totalorder %v738_v60, 15  ;;  %vm3570_vm12 = vcmp.eq.s32.totalorder %v724_v1, 15  ;;  %vm3589_vm13 = vcmp.eq.s32.totalorder %v752_v63, 15  ;;  %s2645_s12 = sshll.u32 %s216_s9, 8  ;;  %s2819_s14 = sshll.u32 %s3197_s22, 12 }
  0x22   : > { %2877 = vmatprep.subr.bf16.mxu1 %v4546_v23  ;;  %s4398_s13 = scalar_lea.vmem [#allocation2], %s2645_s12  ;;  %s4489_s23 = scalar_lea.hbm %s4543_s5, %s2819_s14 }
  0x23   : > { %vm3606_vm14 = vcmp.eq.s32.totalorder %v766_v38, 15  ;;  %s2579_s15 = sshll.u32 %s4398_s13, 4  ;;  %s4497_s25 = scalar_lea.sflag [#allocation3], %s216_s9  ;;  %s4491_s15 = int_to_ptr.vmem [resolvable:$true] %s2579_s15 }
  0x24   : > { %1778 = vmatpush1.bf16.msra.mxu0 %v3041_v24  ;;  %s3076_s22 = scalar_lea.vmem %s4491_s15, 4096  ;;  %s3143_s26 = smov [#allocation2]  }
  0x25   : > { %1779 = vmatprep.subr.bf16.mxu0 %v4546_v23  ;;  %2889 = vmatpush1.bf16.msra.mxu1 %v3043_v26  ;;  %p3077_p11 = scmp.ne.s32.totalorder %s4491_s15, %s3076_s22  ;;  %s3080_s30 = sshll.u32 %s3143_s26, 4  ;;  %s3081_s30 = int_to_ptr.vmem [resolvable:$false] %s3080_s30 }
  0x26   : > { %2878 = vmatprep.subr.bf16.mxu1 %v4546_v23  ;;  %s3082_s6 = scalar_lea.vmem %s3081_s30, 8192  ;;  %p3083_p0 = scmp.lt.s32.totalorder %s4491_s15, %s3081_s30 }
  0x27   : > { %2847 = vmatmul.mubr.msk.bf16.gmra.mrb[4].mxu0 %vm361_vm2, %v3027_v9  ;;  %p3078_p12 = pnand %p3077_p11, %p3214_p5  ;;  %p3084_p1 = scmp.lt.s32.totalorder %s3082_s6, %s3076_s22 }
  0x28   : > { %2850 = vmatprep.mubr.msk.bf16.mxu0 %vm361_vm2, %v3028_v10  ;;  %1780 = vmatpush1.bf16.msra.mxu0 %v3042_v25 }
  0x29   : > { %1781 = vmatprep.subr.bf16.mxu0 %v4546_v23  ;;  %2890 = vmatpush1.bf16.msra.mxu1 %v3044_v27  ;;  %p3079_p13 = pneg %p3078_p12  ;;  %p3085_p2 = por %p3084_p1, %p3083_p0 }
  0x2a   : > { %2879 = vmatprep.subr.bf16.mxu1 %v4546_v23 }
  0x2b   : > { %p3086_p3 = pnand %p3085_p2, %p3079_p13 }
  0x2c   : > { %1782 = vmatpush1.bf16.msra.mxu0 %v3043_v26 }
  0x2d   : > { %1783 = vmatprep.subr.bf16.mxu0 %v4546_v23  ;;  %2891 = vmatpush1.bf16.msra.mxu1 %v3045_v28 }
  0x2e   : > { %2880 = vmatprep.subr.bf16.mxu1 %v4546_v23 }
  0x2f   : > { %2851 = vmatmul.mubr.msk.bf16.gmra.mrb[8].mxu0 %vm361_vm2, %v3029_v11 }
  0x30   : > { %2854 = vmatprep.mubr.msk.bf16.mxu0 %vm361_vm2, %v3030_v12  ;;  %1784 = vmatpush1.bf16.msra.mxu0 %v3044_v27 }
  0x31   : > { %1785 = vmatprep.subr.bf16.mxu0 %v4546_v23  ;;  %2892 = vmatpush1.bf16.msra.mxu1 %v3046_v29 }
  0x32   : > { %2881 = vmatprep.subr.bf16.mxu1 %v4546_v23 }
  0x34   : > { %1786 = vmatpush1.bf16.msra.mxu0 %v3045_v28 }
  0x35   : > { %1787 = vmatprep.subr.bf16.mxu0 %v4546_v23  ;;  %2893 = vmatpush1.bf16.msra.mxu1 %v3047_v30 }
  0x36   : > { %2882 = vmatprep.subr.bf16.mxu1 %v4546_v23 }
  0x37   : > { %2855 = vmatmul.mubr.msk.bf16.gmra.mrb[12].mxu0 %vm361_vm2, %v3031_v13 }
  0x38   : > { %2858 = vmatprep.mubr.msk.bf16.mxu0 %vm361_vm2, %v3032_v14  ;;  %1788 = vmatpush1.bf16.msra.mxu0 %v3046_v29 }
  0x39   : > { %1789 = vmatprep.subr.bf16.mxu0 %v4546_v23  ;;  %2894 = vmatpush1.bf16.msra.mxu1 %v3048_v31 }
  0x3a   : > { %2883 = vmatprep.subr.bf16.mxu1 %v4546_v23 }
  0x3c   : > { %1790 = vmatpush1.bf16.msra.mxu0 %v3047_v30 }
  0x3d   : > { %1791 = vmatprep.subr.bf16.mxu0 %v4546_v23  ;;  %2895 = vmatpush1.bf16.msra.mxu1 %v3049_v32 }
  0x3e   : > { %2884 = vmatprep.subr.bf16.mxu1 %v4546_v23 }
  0x3f   : > { %2859 = vmatmul.mubr.msk.bf16.gmra.mrb[16].mxu0 %vm361_vm2, %v3033_v15 }
  0x40   : > { %2862 = vmatprep.mubr.msk.bf16.mxu0 %vm361_vm2, %v3034_v16  ;;  %1792 = vmatpush1.bf16.msra.mxu0 %v3048_v31  ;;  %v3051_v16 = vld [vmem:[%s4541_s3 + $0xb8] sm:$0xff]  }
  0x41   : > { %1793 = vmatprep.subr.bf16.mxu0 %v4546_v23  ;;  %2896 = vmatpush1.bf16.msra.mxu1 %v3050_v33 }
  0x42   : > { %2885 = vmatprep.subr.bf16.mxu1 %v4546_v23 }
  0x44   : > { %1794 = vmatpush1.bf16.msra.mxu0 %v3049_v32 }
  0x45   : > { %1795 = vmatprep.subr.bf16.mxu0 %v4546_v23  ;;  %2897 = vmatpush1.bf16.msra.mxu1 %v3051_v16 }
  0x46   : > { %2269 = vmatprep.subr.bf16.mxu1 %v4546_v23 }
  0x47   : > { %2863 = vmatmul.mubr.msk.bf16.gmra.mrb[20].mxu0 %vm361_vm2, %v3035_v17 }
  0x48   : > { %2866 = vmatprep.mubr.msk.bf16.mxu0 %vm361_vm2, %v3036_v18  ;;  %1796 = vmatpush1.bf16.msra.mxu0 %v3050_v33 }
  0x49   : > { %1797 = vmatprep.subr.bf16.mxu0 %v4546_v23 }
  0x4c   : > { %1798 = vmatpush1.bf16.msra.mxu0 %v3051_v16 }
  0x4d   : > { %2011 = vmatprep.subr.bf16.mxu0 %v4546_v23 }
  0x4f   : > { %2867 = vmatmul.mubr.msk.bf16.gmra.mrb[24].mxu0 %vm361_vm2, %v3037_v19 }
  0x50   : > { %2870 = vmatprep.mubr.msk.bf16.mxu0 %vm361_vm2, %v3038_v20 }
  0x57   : > { %2871 = vmatmul.mubr.msk.bf16.gmra.mrb[28].mxu0 %vm361_vm2, %v3039_v21  ;;  %v3407_v21 = vadd.s32 168, %v3325_v35 }
  0xf2   : > { %v2844_v42 = vpop.f32.mrb[0].mxu0 }
  0xf3   : > { %v460_v45 = vadd.f32 %v2844_v42, %v3331_v37  ;;  %v451_v46 = vpop.f32.mrb[1].mxu0  ;;  %v3442_v42 = vadd.s32 184, %v3325_v35 }
  0xf4   : > { %v452_v49 = vadd.f32 %v3331_v37, %v451_v46  ;;  %v2845_v50 = vpop.f32.mrb[2].mxu0 }
  0xf5   : > { %v3358_v53 = vmax.f32 %v460_v45, 0.0  ;;  %v463_v54 = vadd.f32 %v2845_v50, %v3331_v37  ;;  %v454_v55 = vpop.f32.mrb[3].mxu0 }
  0xf6   : > { %v3362_v58 = vmax.f32 %v452_v49, 0.0  ;;  %v455_v59 = vadd.f32 %v3331_v37, %v454_v55 }
  0xf7   : > { %v3367_v62 = vmax.f32 %v463_v54, 0.0  ;;  %v1061_v2 = vrot.slane %v3358_v53, 7  ;;  %v1254_v3 = vrot.slane %v3358_v53, 1 }
  0xf8   : > { %v3376_v4 = vmax.f32 %v455_v59, 0.0  ;;  %v4545_v7 = vrot.slane %v3362_v58, 7  ;;  %v4544_v11 = vrot.slane %v3362_v58, 1 }
  0xf9   : > { %v1062_v8 = vrot.slane %v3367_v62, 7  ;;  %v1255_v9 = vrot.slane %v3367_v62, 1 }
  0xfa   : > { %v1060_v12 = vrot.slane %v3376_v4, 7  ;;  %v1253_v13 = vrot.slane %v3376_v4, 1  ;;  %v2848_v14 = vpop.f32.mrb[4].mxu0 }
  0xfb   : > { %v476_v17 = vadd.f32 %v2848_v14, %v3331_v37  ;;  %v467_v18 = vpop.f32.mrb[5].mxu0  ;;  %v1313_v19 = vsel %vm1284_vm3, %v1254_v3, %v1255_v9  ;;  %v3404_v20 = vsel %vm1091_vm5, %v1061_v2, %v1062_v8 }
  0xfc   : > { %v468_v22 = vadd.f32 %v3331_v37, %v467_v18  ;;  %v2849_v24 = vpop.f32.mrb[6].mxu0  ;;  %v1314_v25 = vsel %vm1284_vm3, %v1253_v13, %v1254_v3  ;;  %v1315_v26 = vsel %vm1284_vm3, %v4544_v11, %v1253_v13  ;;  %v3420_v27 = vsel %vm1091_vm5, %v4545_v7, %v1060_v12 }
  0xfd   : > { %v3422_v28 = vmax.f32 %v476_v17, 0.0  ;;  %v479_v29 = vadd.f32 %v2849_v24, %v3331_v37  ;;  %v470_v30 = vpop.f32.mrb[7].mxu0  ;;  %v1382_v31 = vsel %vm3353_vm4, 0.0, %v1314_v25  ;;  %v3429_v32 = vsel %vm1091_vm5, %v1060_v12, %v1061_v2 }
  0xfe   : > { %v3431_v33 = vmax.f32 %v468_v22, 0.0  ;;  %v471_v34 = vadd.f32 %v3331_v37, %v470_v30  ;;  %v3434_v36 = vpack.c.bf16 %v1382_v31, %v1315_v26 }
  0xff   : > { %v3437_v39 = vmax.f32 %v479_v29, 0.0  ;;  %v1065_v44 = vrot.slane %v3422_v28, 7  ;;  %v1258_v51 = vrot.slane %v3422_v28, 1 }
 0x100   : > { %4564 = vst [vmem:[#allocation5_spill] sm:$0xff] %v3434_v36  ;;  %v1063_v45 = vrot.slane %v3431_v33, 7  ;;  %v1256_v46 = vrot.slane %v3431_v33, 1  ;;  %v3447_v49 = vmax.f32 %v471_v34, 0.0  ;;  %2719 = vmatprep.mubr.msk.bf16.mxu0 %vm1541_vm6, %v3434_v36 }
 0x101   : > { %v1066_v52 = vrot.slane %v3437_v39, 7  ;;  %v1259_v54 = vrot.slane %v3437_v39, 1 }
 0x102   : > { %v1064_v56 = vrot.slane %v3447_v49, 7  ;;  %v1257_v59 = vrot.slane %v3447_v49, 1  ;;  %v2852_v2 = vpop.f32.mrb[8].mxu0  ;;  %v1312_v3 = vsel %vm1284_vm3, %v1255_v9, %v1256_v46  ;;  %v3475_v18 = vsel %vm1091_vm5, %v1062_v8, %v1063_v45 }
 0x103   : > { %v492_v13 = vadd.f32 %v2852_v2, %v3331_v37  ;;  %v483_v14 = vpop.f32.mrb[9].mxu0  ;;  %v1384_v17 = vsel %vm3378_vm7, 0.0, %v1312_v3  ;;  %v1309_v22 = vsel %vm1284_vm3, %v1258_v51, %v1259_v54  ;;  %v3512_v3 = vadd.s32 248, %v3325_v35 }
 0x104   : > { %v484_v24 = vadd.f32 %v3331_v37, %v483_v14  ;;  %v2853_v9 = vpop.f32.mrb[10].mxu0  ;;  %v3480_v61 = vpack.c.bf16 %v1384_v17, %v1313_v19  ;;  %v1310_v25 = vsel %vm1284_vm3, %v1257_v59, %v1258_v51  ;;  %v1311_v26 = vsel %vm1284_vm3, %v1256_v46, %v1257_v59 }
 0x105   : > { %v3486_v5 = vmax.f32 %v492_v13, 0.0  ;;  %v495_v29 = vadd.f32 %v2853_v9, %v3331_v37  ;;  %v486_v8 = vpop.f32.mrb[11].mxu0  ;;  %v1386_v30 = vsel %vm3395_vm8, 0.0, %v1310_v25  ;;  %v3493_v31 = vsel %vm1091_vm5, %v1063_v45, %v1064_v56 }
 0x106   : > { %v3495_v19 = vmax.f32 %v484_v24, 0.0  ;;  %v487_v34 = vadd.f32 %v3331_v37, %v486_v8  ;;  %v3498_v51 = vpack.c.bf16 %v1386_v30, %v1311_v26  ;;  %v3509_v45 = vsel %vm1091_vm5, %v1065_v44, %v1066_v52 }
 0x107   : > { %v1069_v59 = vrot.slane %v3486_v5, 7  ;;  %v3502_v2 = vmax.f32 %v495_v29, 0.0  ;;  %v3520_v24 = vsel %vm1091_vm5, %v1064_v56, %v1065_v44  ;;  %v1262_v9 = vrot.slane %v3486_v5, 1 }
 0x108   : > { %v1067_v13 = vrot.slane %v3495_v19, 7  ;;  %v1260_v14 = vrot.slane %v3495_v19, 1  ;;  %v3516_v17 = vmax.f32 %v487_v34, 0.0 }
 0x109   : > { %v1070_v25 = vrot.slane %v3502_v2, 7  ;;  %v4548_v26 = vrot.slane %v3502_v2, 1 }
 0x10a   : > { %v1068_v8 = vrot.slane %v3516_v17, 7  ;;  %v1261_v30 = vrot.slane %v3516_v17, 1  ;;  %v2856_v34 = vpop.f32.mrb[12].mxu0  ;;  %v1308_v16 = vsel %vm1284_vm3, %v1259_v54, %v1260_v14  ;;  %v3546_v60 = vsel %vm1091_vm5, %v1066_v52, %v1067_v13 }
 0x10b   : > { %v508_v11 = vadd.f32 %v2856_v34, %v3331_v37  ;;  %v499_v7 = vpop.f32.mrb[13].mxu0  ;;  %v1388_v43 = vsel %vm3451_vm9, 0.0, %v1308_v16  ;;  %v3552_v29 = vsel %vm1284_vm3, %v1262_v9, %v4548_v26  ;;  %v3585_v48 = vsel %vm1091_vm5, %v1069_v59, %v1070_v25 }
 0x10c   : > { %v500_v23 = vadd.f32 %v3331_v37, %v499_v7  ;;  %v2857_v56 = vpop.f32.mrb[14].mxu0  ;;  %v3555_v54 = vpack.c.bf16 %v1388_v43, %v1309_v22  ;;  %v1306_v34 = vsel %vm1284_vm3, %v1261_v30, %v1262_v9  ;;  %v1307_v50 = vsel %vm1284_vm3, %v1260_v14, %v1261_v30  ;;  %4575 = vst [vmem:[#allocation8_spill] sm:$0xff] %v3585_v48 }
 0x10d   : > { %v592_v16 = vmax.f32 %v508_v11, 0.0  ;;  %v511_v52 = vadd.f32 %v2857_v56, %v3331_v37  ;;  %v502_v55 = vpop.f32.mrb[15].mxu0  ;;  %v1390_v57 = vsel %vm3466_vm10, 0.0, %v1306_v34  ;;  %v3566_v46 = vsel %vm1091_vm5, %v1067_v13, %v1068_v8 }
 0x10e   : > { %4571 = vst [vmem:[#allocation6_spill] sm:$0xff] %v3555_v54  ;;  %v590_v22 = vmax.f32 %v500_v23, 0.0  ;;  %v503_v14 = vadd.f32 %v3331_v37, %v502_v55  ;;  %v3575_v11 = vpack.c.bf16 %v1390_v57, %v1307_v50  ;;  %v3581_v56 = vadd.s32 200, %v3325_v35 }
 0x10f   : > { %v1073_v30 = vrot.slane %v592_v16, 7  ;;  %v3578_v12 = vmax.f32 %v511_v52, 0.0  ;;  %v1266_v1 = vrot.slane %v592_v16, 1  ;;  %v3595_v55 = vsel %vm1091_vm5, %v1068_v8, %v1069_v59 }
 0x110   : > { %4574 = vst [vmem:[#allocation7_spill] sm:$0xff] %v3575_v11  ;;  %v1071_v13 = vrot.slane %v590_v22, 7  ;;  %v591_v43 = vmax.f32 %v503_v14, 0.0  ;;  %4578 = vst [vmem:[#allocation9_spill] sm:$0xff] %v3595_v55  ;;  %v1264_v57 = vrot.slane %v590_v22, 1 }
 0x111   : > { %v1074_v34 = vrot.slane %v3578_v12, 7  ;;  %v1267_v50 = vrot.slane %v3578_v12, 1  ;;  %v2947_v52 = vpack.i.bf16 %v3578_v12, %v592_v16 }
 0x112   : > { %v1072_v9 = vrot.slane %v591_v43, 7  ;;  %v1265_v10 = vrot.slane %v591_v43, 1  ;;  %v2860_v14 = vpop.f32.mrb[16].mxu0  ;;  %v2942_v15 = vpack.i.bf16 %v591_v43, %v590_v22  ;;  %v3602_v47 = vsel %vm1091_vm5, %v1070_v25, %v1071_v13 }
 0x113   : > { %v524_v59 = vadd.f32 %v2860_v14, %v3331_v37  ;;  %v515_v8 = vpop.f32.mrb[17].mxu0  ;;  %v1301_v16 = vsel %vm1284_vm3, %v1266_v1, %v1267_v50  ;;  %v3615_v12 = vsel %vm1091_vm5, %v1073_v30, %v1074_v34  ;;  %v3618_v22 = vadd.s32 216, %v3325_v35 }
 0x114   : > { %v516_v25 = vadd.f32 %v3331_v37, %v515_v8  ;;  %v2861_v0 = vpop.f32.mrb[18].mxu0  ;;  %2943 = vrot.lane.b32.xlu0 %v2942_v15, %s3142_s8  ;;  %v1302_v38 = vsel %vm1284_vm3, %v1265_v10, %v1266_v1  ;;  %v1303_v43 = vsel %vm1284_vm3, %v1264_v57, %v1265_v10  ;;  %v3628_v14 = vsel %vm1091_vm5, %v1071_v13, %v1072_v9 }
 0x115   : > { %v596_v41 = vmax.f32 %v524_v59, 0.0  ;;  %v527_v40 = vadd.f32 %v2861_v0, %v3331_v37  ;;  %v518_v26 = vpop.f32.mrb[19].mxu0  ;;  %v1394_v8 = vsel %vm3531_vm11, 0.0, %v1302_v38  ;;  %v3635_v15 = vsel %vm1091_vm5, %v1072_v9, %v1073_v30 }
 0x116   : > { %v594_v36 = vmax.f32 %v516_v25, 0.0  ;;  %v519_v1 = vadd.f32 %v3331_v37, %v518_v26  ;;  %v3638_v11 = vpack.c.bf16 %v1394_v8, %v1303_v43  ;;  %v4582_v0 = vrot.slane %v3502_v2, 1 }
 0x117   : > { %v1077_v13 = vrot.slane %v596_v41, 7  ;;  %v1270_v48 = vrot.slane %v596_v41, 1  ;;  %v3641_v59 = vmax.f32 %v527_v40, 0.0  ;;  %v4583_v26 = vand.u32 15, %v3383_v6 }
 0x118   : > { %4581 = vst [vmem:[#allocation10_spill] sm:$0xff] %v3638_v11  ;;  %v1304_v44 = vsel %vm1284_vm3, %v4582_v0, %v1264_v57  ;;  %v1075_v38 = vrot.slane %v594_v36, 7  ;;  %v1268_v54 = vrot.slane %v594_v36, 1  ;;  %v595_v9 = vmax.f32 %v519_v1, 0.0  ;;  %2948 = vrot.lane.b32.xlu0 %v2947_v52, %s3142_s8  ;;  %2725 = vmatprep.mubr.msk.bf16.mxu1 %vm1541_vm6, %v3638_v11 }
 0x119   : > { %vm3652_vm15 = vcmp.eq.s32.totalorder %v4583_v26, 15  ;;  %v1392_v40 = vsel %vm3570_vm12, 0.0, %v1304_v44  ;;  %v1078_v25 = vrot.slane %v3641_v59, 7  ;;  %v1271_v57 = vrot.slane %v3641_v59, 1 }
 0x11a   : > { %v2957_v43 = vpack.i.bf16 %v3641_v59, %v596_v41  ;;  %v3662_v52 = vpack.c.bf16 %v1392_v40, %v3552_v29  ;;  %v1076_v8 = vrot.slane %v595_v9, 7  ;;  %v1269_v1 = vrot.slane %v595_v9, 1  ;;  %v2864_v0 = vpop.f32.mrb[20].mxu0 }
 0x11b   : > { %v2952_v6 = vpack.i.bf16 %v595_v9, %v594_v36  ;;  %v1300_v26 = vsel %vm1284_vm3, %v1267_v50, %v1268_v54  ;;  %v4587_v10 = vand.u32 15, %v3407_v21  ;;  %v540_v44 = vadd.f32 %v2864_v0, %v3331_v37  ;;  %v531_v11 = vpop.f32.mrb[21].mxu0 }
 0x11c   : > { %4586 = vst [vmem:[#allocation11_spill] sm:$0xff] %v3662_v52  ;;  %v1396_v41 = vsel %vm3589_vm13, 0.0, %v1300_v26  ;;  %v3677_v29 = vsel %vm1091_vm5, %v1074_v34, %v1075_v38  ;;  %v1297_v36 = vsel %vm1284_vm3, %v1270_v48, %v1271_v57  ;;  %v532_v50 = vadd.f32 %v3331_v37, %v531_v11  ;;  %v2865_v21 = vpop.f32.mrb[22].mxu0 }
 0x11d   : > { %vm3668_vm0 = vcmp.eq.s32.totalorder %v4587_v10, 15  ;;  %2953 = vrot.lane.b32.xlu1 %v2952_v6, %s3142_s8  ;;  %v4590_v10 = vpack.i.bf16 %v3376_v4, %v3362_v58  ;;  %v3687_v59 = vpack.c.bf16 %v1396_v41, %v1301_v16  ;;  %v1298_v23 = vsel %vm1284_vm3, %v1269_v1, %v1270_v48  ;;  %v534_v0 = vpop.f32.mrb[23].mxu0 }
 0x11e   : > { %v600_v9 = vmax.f32 %v540_v44, 0.0  ;;  %v543_v40 = vadd.f32 %v2865_v21, %v3331_v37  ;;  %v1299_v11 = vsel %vm1284_vm3, %v1268_v54, %v1269_v1  ;;  %v1398_v6 = vsel %vm3606_vm14, 0.0, %v1298_v23 }
 0x11f   : > { %2963 = vrot.lane.b32.xlu0 %v4590_v10, %s3142_s8  ;;  %v598_v26 = vmax.f32 %v532_v50, 0.0  ;;  %v535_v4 = vadd.f32 %v3331_v37, %v534_v0  ;;  %v3698_v16 = vpack.c.bf16 %v1398_v6, %v1299_v11  ;;  %v3702_v48 = vsel %vm1091_vm5, %v1075_v38, %v1076_v8 }
 0x120   : > { %v1274_v41 = vrot.slane %v600_v9, 1  ;;  %v3704_v44 = vmax.f32 %v543_v40, 0.0  ;;  %v3708_v21 = vsel %vm1091_vm5, %v1077_v13, %v1078_v25  ;;  %v3711_v54 = vadd.s32 232, %v3325_v35 }
 0x121   : > { %v1079_v63 = vrot.slane %v598_v26, 7  ;;  %v1272_v1 = vrot.slane %v598_v26, 1  ;;  %v599_v50 = vmax.f32 %v535_v4, 0.0  ;;  %2958 = vrot.lane.b32.xlu1 %v2957_v43, %s3142_s8  ;;  %v4591_v38 = vpack.i.bf16 %v3367_v62, %v3358_v53 }
 0x122   : > { %v3720_v10 = vsel %vm1091_vm5, %v1076_v8, %v1077_v13  ;;  %v4592_v23 = vand.u32 15, %v3442_v42  ;;  %v1081_v0 = vrot.slane %v600_v9, 7  ;;  %v1082_v11 = vrot.slane %v3704_v44, 7  ;;  %v2868_v62 = vpop.f32.mrb[24].mxu0 }
 0x123   : > { %2973 = vrot.lane.b32.xlu0 %v4591_v38, %s3142_s8  ;;  %v1275_v43 = vrot.slane %v3704_v44, 1  ;;  %v2977_v6 = vpack.i.bf16 %v3704_v44, %v600_v9  ;;  %v1080_v4 = vrot.slane %v599_v50, 7  ;;  %v1273_v53 = vrot.slane %v599_v50, 1  ;;  %v547_v8 = vpop.f32.mrb[25].mxu0 }
 0x124   : > { %vm3724_vm1 = vcmp.eq.s32.totalorder %v4592_v23, 15  ;;  %v2967_v38 = vpack.i.bf16 %v599_v50, %v598_v26  ;;  %v1296_v13 = vsel %vm1284_vm3, %v1271_v57, %v1272_v1  ;;  %v556_v42 = vadd.f32 %v2868_v62, %v3331_v37  ;;  %v2869_v52 = vpop.f32.mrb[26].mxu0 }
 0x125   : > { %v1400_v23 = vsel %vm3652_vm15, 0.0, %v1296_v13  ;;  %v3738_v34 = vsel %vm1091_vm5, %v1078_v25, %v1079_v63  ;;  %v1293_v9 = vsel %vm1284_vm3, %v1274_v41, %v1275_v43  ;;  %v548_v44 = vadd.f32 %v3331_v37, %v547_v8 }
 0x126   : > { %2968 = vrot.lane.b32.xlu1 %v2967_v38, %s3142_s8  ;;  %v4595_v57 = vpack.i.bf16 %v3447_v49, %v3431_v33  ;;  %v3748_v26 = vpack.c.bf16 %v1400_v23, %v1297_v36  ;;  %v1294_v30 = vsel %vm1284_vm3, %v1273_v53, %v1274_v41  ;;  %v4596_v25 = vand.u32 15, %v3581_v56  ;;  %v550_v38 = vpop.f32.mrb[27].mxu0 }
 0x127   : > { %v604_v62 = vmax.f32 %v556_v42, 0.0  ;;  %v559_v13 = vadd.f32 %v2869_v52, %v3331_v37  ;;  %v1295_v8 = vsel %vm1284_vm3, %v1272_v1, %v1273_v53  ;;  %v1402_v33 = vsel %vm3668_vm0, 0.0, %v1294_v30 }
 0x128   : > { %2983 = vrot.lane.b32.xlu0 %v4595_v57, %s3142_s8  ;;  %vm3754_vm2 = vcmp.eq.s32.totalorder %v4596_v25, 15  ;;  %v602_v49 = vmax.f32 %v548_v44, 0.0  ;;  %v551_v36 = vadd.f32 %v3331_v37, %v550_v38  ;;  %v3764_v41 = vpack.c.bf16 %v1402_v33, %v1295_v8 }
 0x129   : > { %v3768_v56 = vsel %vm1091_vm5, %v1079_v63, %v1080_v4  ;;  %v1278_v23 = vrot.slane %v604_v62, 1  ;;  %v605_v42 = vmax.f32 %v559_v13, 0.0  ;;  %v3772_v52 = vsel %vm1091_vm5, %v1081_v0, %v1082_v11 }
 0x12a   : > { %4599 = vst [vmem:[#allocation12_spill] sm:$0xff] %v3764_v41  ;;  %v850_v1 = vand.u32 15, %v3711_v54  ;;  %v1083_v53 = vrot.slane %v602_v49, 7  ;;  %v1276_v7 = vrot.slane %v602_v49, 1  ;;  %v603_v57 = vmax.f32 %v551_v36, 0.0  ;;  %2978 = vrot.lane.b32.xlu1 %v2977_v6, %s3142_s8  ;;  %v2872_v33 = vpop.f32.mrb[28].mxu0 }
 0x12b   : > { %v4600_v44 = vpack.i.bf16 %v3437_v39, %v3422_v28  ;;  %v3782_v63 = vsel %vm1091_vm5, %v1080_v4, %v1081_v0  ;;  %v1085_v30 = vrot.slane %v604_v62, 7  ;;  %v1086_v25 = vrot.slane %v605_v42, 7  ;;  %v563_v55 = vpop.f32.mrb[29].mxu0 }
 0x12c   : > { %v1279_v13 = vrot.slane %v605_v42, 1  ;;  %v2997_v38 = vpack.i.bf16 %v605_v42, %v604_v62  ;;  %v1084_v8 = vrot.slane %v603_v57, 7  ;;  %v1277_v54 = vrot.slane %v603_v57, 1 }
 0x12d   : > { %2993 = vrot.lane.b32.xlu0 %v4600_v44, %s3142_s8  ;;  %v2987_v41 = vpack.i.bf16 %v603_v57, %v602_v49  ;;  %v1292_v6 = vsel %vm1284_vm3, %v1275_v43, %v1276_v7  ;;  %v572_v36 = vadd.f32 %v2872_v33, %v3331_v37  ;;  %v3791_v39 = vsel %vm1091_vm5, %v1082_v11, %v1083_v53  ;;  %v2873_v49 = vpop.f32.mrb[30].mxu0 }
 0x12e   : > { %v1404_v28 = vsel %vm3724_vm1, 0.0, %v1292_v6  ;;  %v1289_v0 = vsel %vm1284_vm3, %v1278_v23, %v1279_v13  ;;  %v4601_v4 = vand.u32 15, %v3512_v3  ;;  %v564_v43 = vadd.f32 %v3331_v37, %v563_v55 }
 0x12f   : > { %2988 = vrot.lane.b32.xlu1 %v2987_v41, %s3142_s8  ;;  %v4604_v40 = vpack.i.bf16 %v3516_v17, %v3495_v19  ;;  %v3807_v11 = vpack.c.bf16 %v1404_v28, %v1293_v9  ;;  %v1290_v42 = vsel %vm1284_vm3, %v1277_v54, %v1278_v23  ;;  %v4605_v3 = vand.u32 15, %v3618_v22  ;;  %v566_v41 = vpop.f32.mrb[31].mxu0 }
 0x130   : > { %vm3797_vm4 = vcmp.eq.s32.totalorder %v4601_v4, 15  ;;  %v608_v55 = vmax.f32 %v572_v36, 0.0  ;;  %v575_v44 = vadd.f32 %v2873_v49, %v3331_v37  ;;  %v1291_v33 = vsel %vm1284_vm3, %v1276_v7, %v1277_v54 }
 0x131   : > { %3003 = vrot.lane.b32.xlu0 %v4604_v40, %s3142_s8  ;;  %vm3813_vm7 = vcmp.eq.s32.totalorder %v4605_v3, 15  ;;  %v1406_v19 = vsel %vm3754_vm2, 0.0, %v1290_v42  ;;  %v606_v17 = vmax.f32 %v564_v43, 0.0  ;;  %v567_v9 = vadd.f32 %v3331_v37, %v566_v41 }
 0x132   : > { %v3823_v23 = vpack.c.bf16 %v1406_v19, %v1291_v33  ;;  %v3827_v22 = vsel %vm1091_vm5, %v1083_v53, %v1084_v8  ;;  %v1282_v6 = vrot.slane %v608_v55, 1  ;;  %v609_v36 = vmax.f32 %v575_v44, 0.0 }
 0x133   : > { %v3831_v28 = vsel %vm1091_vm5, %v1085_v30, %v1086_v25  ;;  %vm3833_vm8 = vcmp.eq.s32.totalorder %v850_v1, 15  ;;  %v1087_v50 = vrot.slane %v606_v17, 7  ;;  %v1280_v54 = vrot.slane %v606_v17, 1  ;;  %2998 = vrot.lane.b32.xlu1 %v2997_v38, %s3142_s8 }
 0x134   : > { %v607_v4 = vmax.f32 %v567_v9, 0.0  ;;  %v4610_v37 = vpack.i.bf16 %v3502_v2, %v3486_v5  ;;  %v3844_v53 = vsel %vm1091_vm5, %v1084_v8, %v1085_v30  ;;  %v1089_v43 = vrot.slane %v608_v55, 7 }
 0x135   : > { %v1090_v49 = vrot.slane %v609_v36, 7  ;;  %v1283_v1 = vrot.slane %v609_v36, 1  ;;  %v3017_v40 = vpack.i.bf16 %v609_v36, %v608_v55  ;;  %v1288_v41 = vsel %vm1284_vm3, %v1279_v13, %v1280_v54 }
 0x136   : > { %3013 = vrot.lane.b32.xlu0 %v4610_v37, %s3142_s8  ;;  %v1088_v42 = vrot.slane %v607_v4, 7  ;;  %v1281_v3 = vrot.slane %v607_v4, 1  ;;  %v3007_v44 = vpack.i.bf16 %v607_v4, %v606_v17  ;;  %v4611_v38 = vrot.slane %v3362_v58, 7 }
 0x137   : > { %v1408_v2 = vsel %vm3813_vm7, 0.0, %v1288_v41  ;;  %v3858_v30 = vsel %vm1091_vm5, %v1086_v25, %v1087_v50  ;;  %v1285_v8 = vsel %vm1284_vm3, %v1282_v6, %v1283_v1  ;;  %v4612_v19 = vrot.slane %v3362_v58, 1 }
 0x138   : > { %v3852_v5 = vsel %vm1091_vm5, %v1090_v49, %v4611_v38  ;;  %3008 = vrot.lane.b32.xlu1 %v3007_v44, %s3142_s8  ;;  %v3863_v55 = vpack.c.bf16 %v1408_v2, %v1289_v0  ;;  %v1286_v13 = vsel %vm1284_vm3, %v1281_v3, %v1282_v6  ;;  %v1287_v33 = vsel %vm1284_vm3, %v1280_v54, %v1281_v3 }
 0x139   : > { %v1410_v57 = vsel %vm3833_vm8, 0.0, %v1286_v13  ;;  %v3873_v25 = vsel %vm1091_vm5, %v1087_v50, %v1088_v42  ;;  %v1316_v17 = vsel %vm1284_vm3, %v1283_v1, %v4612_v19  ;;  %v3885_v6 = vsel %vm1091_vm5, %v1089_v43, %v1090_v49 }
 0x13a   : > { %v3879_v0 = vpack.c.bf16 %v1410_v57, %v1287_v33  ;;  %v1412_v9 = vsel %vm3797_vm4, 0.0, %v1316_v17  ;;  %v3889_v36 = vsel %vm1091_vm5, %v1088_v42, %v1089_v43  ;;  %v623_v58 = vadd.s32 96, %v3325_v35  ;;  %v3052_v33 = vld [vmem:[%s4541_s3 + $0xc0] sm:$0xff]  }
 0x13b   : > { %v3891_v7 = vpack.c.bf16 %v1412_v9, %v1285_v8  ;;  %v625_v50 = vadd.s32 112, %v3325_v35  ;;  %v613_v62 = vadd.s32 16, %v3325_v35  ;;  %v615_v37 = vadd.s32 32, %v3325_v35 }
 0x13c   : > { %3018 = vrot.lane.b32.xlu1 %v3017_v40, %s3142_s8  ;;  %v731_v54 = vand.u32 15, %v623_v58  ;;  %v627_v49 = vadd.s32 128, %v3325_v35  ;;  %v629_v43 = vadd.s32 144, %v3325_v35  ;;  %v617_v2 = vadd.s32 48, %v3325_v35 }
 0x13d   : > { %v745_v4 = vand.u32 15, %v625_v50  ;;  %v661_v44 = vand.u32 15, %v613_v62  ;;  %v675_v38 = vand.u32 15, %v615_v37  ;;  %v647_v57 = vand.u32 15, %v3325_v35 }
 0x13e   : > { %vm1039_vm3 = vcmp.eq.s32.totalorder %v731_v54, 0  ;;  %v759_v19 = vand.u32 15, %v627_v49  ;;  %v773_v9 = vand.u32 15, %v629_v43  ;;  %v689_v62 = vand.u32 15, %v617_v2  ;;  %v3053_v49 = vld [vmem:[%s4541_s3 + $0xc8] sm:$0xff]   ;;  %v3054_v43 = vld [vmem:[%s4541_s3] sm:$0xff]  }
 0x13f   : > { %v1200_v40 = vsel %vm1039_vm3, 0.0, %v3602_v47  ;;  %vm3901_vm5 = vcmp.eq.s32.totalorder %v745_v4, 0  ;;  %vm3919_vm9 = vcmp.eq.s32.totalorder %v661_v44, 0  ;;  %v631_v4 = vadd.s32 160, %v3325_v35 }
 0x140   : > { %v1202_v54 = vsel %vm3901_vm5, 0.0, %v3635_v15  ;;  %vm3926_vm10 = vcmp.eq.s32.totalorder %v647_v57, 0  ;;  %vm3936_vm11 = vcmp.eq.s32.totalorder %v759_v19, 0  ;;  %vm3940_vm12 = vcmp.eq.s32.totalorder %v675_v38, 0 }
 0x141   : > { %vm3947_vm13 = vcmp.eq.s32.totalorder %v773_v9, 0  ;;  %v1188_v19 = vsel %vm3926_vm10, 0.0, %v3852_v5  ;;  %v787_v9 = vand.u32 15, %v631_v4  ;;  %vm3970_vm14 = vcmp.eq.s32.totalorder %v689_v62, 0 }
 0x142   : > { %v3987_v62 = vadd.s32 192, %v3325_v35 }
 0x143   : > { %vm4006_vm15 = vcmp.eq.s32.totalorder %v787_v9, 0 }
 0x186   : > { %v2944_v1 = vpop.permute.xlu0 %2943 }
 0x187   : > { %v2946_v42 = vunpack.i.h.bf16 %v2944_v1  ;;  %v2945_v3 = vunpack.i.l.bf16 %v2944_v1 }
 0x189   : > { %v1554_v8 = vsel %vm1541_vm6, %v1200_v40, %v2945_v3  ;;  %v1555_v13 = vsel %vm1541_vm6, %v3628_v14, %v2946_v42  ;;  %v4623_v40 = vmov 0  }
 0x18a   : > { %v2949_v47 = vpop.permute.xlu0 %2948  ;;  %v3913_v17 = vpack.c.bf16 %v1555_v13, %v1554_v8  ;;  %v3955_v8 = vadd.s32 80, %v3325_v35 }
 0x18b   : > { %v2951_v58 = vunpack.i.h.bf16 %v2949_v47  ;;  %v2950_v50 = vunpack.i.l.bf16 %v2949_v47  ;;  %v1204_v47 = vsel %vm3936_vm11, 0.0, %v3677_v29 }
 0x18c   : > { %1856 = vmatmul.mubr.bf16.vlgmr.msra.gmra.mrb[0].mxu1 %v3913_v17 }
 0x18d   : > { %2270 = vmatpush1.bf16.msra.mxu1 %v3052_v33  ;;  %2726 = vmatprep.mubr.msk.bf16.mxu1 %vm1541_vm6, %v3687_v59  ;;  %v1556_v15 = vsel %vm1541_vm6, %v1202_v54, %v2950_v50  ;;  %v1557_v1 = vsel %vm1541_vm6, %v3615_v12, %v2951_v58  ;;  %v3952_v12 = vadd.s32 64, %v3325_v35  ;;  %v633_v58 = vadd.s32 176, %v3325_v35 }
 0x18e   : > { %2271 = vmatprep.subr.bf16.mxu1 %v4623_v40  ;;  %v3945_v41 = vpack.c.bf16 %v1557_v1, %v1556_v15 }
 0x18f   : > { %v2954_v3 = vpop.permute.xlu1 %2953 }
 0x190   : > { %v2956_v38 = vunpack.i.h.bf16 %v2954_v3  ;;  %v2955_v13 = vunpack.i.l.bf16 %v2954_v3 }
 0x191   : > { %v2964_v44 = vpop.permute.xlu0 %2963  ;;  %2272 = vmatpush1.bf16.msra.mxu1 %v3053_v49 }
 0x192   : > { %v2966_v33 = vunpack.i.h.bf16 %v2964_v44  ;;  %v2965_v57 = vunpack.i.l.bf16 %v2964_v44  ;;  %v1558_v15 = vsel %vm1541_vm6, %v1204_v47, %v2955_v13  ;;  %v1559_v1 = vsel %vm1541_vm6, %v3702_v48, %v2956_v38  ;;  %2273 = vmatprep.subr.bf16.mxu1 %v4623_v40 }
 0x193   : > { %v2959_v29 = vpop.permute.xlu1 %2958  ;;  %v3983_v49 = vpack.c.bf16 %v1559_v1, %v1558_v15  ;;  %v703_v48 = vand.u32 15, %v3952_v12  ;;  %v801_v12 = vand.u32 15, %v633_v58  ;;  %v637_v15 = vadd.s32 208, %v3325_v35 }
 0x194   : > { %v1542_v50 = vsel %vm1541_vm6, %v1188_v19, %v2965_v57  ;;  %v1543_v54 = vsel %vm1541_vm6, %v3420_v27, %v2966_v33  ;;  %v3056_v27 = vld [vmem:[%s4541_s3 + $0xd0] sm:$0xff]   ;;  %v2961_v3 = vunpack.i.h.bf16 %v2959_v29  ;;  %v2960_v44 = vunpack.i.l.bf16 %v2959_v29  ;;  %1864 = vmatmul.mubr.bf16.gmra.mrb[4].mxu1 %v3945_v41 }
 0x195   : > { %v3974_v37 = vpack.c.bf16 %v1543_v54, %v1542_v50  ;;  %v2974_v4 = vpop.permute.xlu0 %2973  ;;  %v1190_v33 = vsel %vm3919_vm9, 0.0, %v3429_v32  ;;  %v1206_v57 = vsel %vm3947_vm13, 0.0, %v3720_v10  ;;  %v717_v19 = vand.u32 15, %v3955_v8  ;;  %2727 = vmatprep.mubr.msk.bf16.mxu1 %vm1541_vm6, %v3698_v16  ;;  %v3055_v8 = vld [vmem:[%s4541_s3 + $0x8] sm:$0xff]   ;;  %2274 = vmatpush1.bf16.msra.mxu1 %v3056_v27 }
 0x196   : > { %v2976_v38 = vunpack.i.h.bf16 %v2974_v4  ;;  %v2975_v13 = vunpack.i.l.bf16 %v2974_v4  ;;  %v1560_v32 = vsel %vm1541_vm6, %v1206_v57, %v2960_v44  ;;  %v1561_v9 = vsel %vm1541_vm6, %v3708_v21, %v2961_v3  ;;  %2275 = vmatprep.subr.bf16.mxu1 %v4623_v40 }
 0x197   : > { %1808 = vmatmul.mubr.bf16.vlgmr.msra.gmra.mrb[32].mxu0 %v3974_v37  ;;  %v815_v54 = vand.u32 15, %v3987_v62  ;;  %v1192_v27 = vsel %vm3940_vm12, 0.0, %v3475_v18  ;;  %v4027_v44 = vpack.c.bf16 %v1561_v9, %v1560_v32  ;;  %v1208_v21 = vsel %vm4006_vm15, 0.0, %v3738_v34  ;;  %v3057_v34 = vld [vmem:[%s4541_s3 + $0x10] sm:$0xff]  }
 0x198   : > { %2720 = vmatprep.mubr.msk.bf16.mxu0 %vm1541_vm6, %v3480_v61  ;;  %v1544_v47 = vsel %vm1541_vm6, %v1190_v33, %v2975_v13  ;;  %v1545_v50 = vsel %vm1541_vm6, %v3404_v20, %v2976_v38  ;;  %2012 = vmatpush1.bf16.msra.mxu0 %v3054_v43  ;;  %v2969_v10 = vpop.permute.xlu1 %2968  ;;  %v3058_v20 = vld [vmem:[%s4541_s3 + $0xd8] sm:$0xff]   ;;  %vm4032_vm0 = vcmp.eq.s32.totalorder %v801_v12, 0  ;;  %v3061_v12 = vld [vmem:[%s4541_s3 + $0xe0] sm:$0xff]   ;;  %vm4060_vm1 = vcmp.eq.s32.totalorder %v703_v48, 0 }
 0x199   : > { %v4013_v58 = vpack.c.bf16 %v1545_v50, %v1544_v47  ;;  %v2971_v1 = vunpack.i.h.bf16 %v2969_v10  ;;  %v2970_v29 = vunpack.i.l.bf16 %v2969_v10  ;;  %2013 = vmatprep.subr.bf16.mxu0 %v4623_v40  ;;  %2276 = vmatpush1.bf16.msra.mxu1 %v3058_v20  ;;  %v829_v47 = vand.u32 15, %v637_v15  ;;  %v4645_v15 = vld [vmem:[#allocation8_spill] sm:$0xff] }
 0x19a   : > { %v2984_v2 = vpop.permute.xlu0 %2983  ;;  %v639_v50 = vadd.s32 224, %v3325_v35  ;;  %2277 = vmatprep.subr.bf16.mxu1 %v4623_v40  ;;  %v1210_v20 = vsel %vm4032_vm0, 0.0, %v3782_v63  ;;  %vm4067_vm2 = vcmp.eq.s32.totalorder %v717_v19, 0  ;;  %vm4079_vm4 = vcmp.eq.s32.totalorder %v815_v54, 0 }
 0x19b   : > { %v2986_v4 = vunpack.i.h.bf16 %v2984_v2  ;;  %v2985_v43 = vunpack.i.l.bf16 %v2984_v2  ;;  %v1562_v13 = vsel %vm1541_vm6, %v1208_v21, %v2970_v29  ;;  %v1563_v18 = vsel %vm1541_vm6, %v3768_v56, %v2971_v1  ;;  %v3059_v1 = vld [vmem:[%s4541_s3 + $0x18] sm:$0xff]  }
 0x19c   : > { %2014 = vmatpush1.bf16.msra.mxu0 %v3055_v8  ;;  %v2979_v42 = vpop.permute.xlu1 %2978  ;;  %1872 = vmatmul.mubr.bf16.gmra.mrb[8].mxu1 %v3983_v49  ;;  %v1194_v2 = vsel %vm3970_vm14, 0.0, %v3520_v24  ;;  %vm4093_vm7 = vcmp.eq.s32.totalorder %v829_v47, 0 }
 0x19d   : > { %v1546_v3 = vsel %vm1541_vm6, %v1192_v27, %v2985_v43  ;;  %v1547_v38 = vsel %vm1541_vm6, %v3493_v31, %v2986_v4  ;;  %v4050_v31 = vpack.c.bf16 %v1563_v18, %v1562_v13  ;;  %v2981_v56 = vunpack.i.h.bf16 %v2979_v42  ;;  %2015 = vmatprep.subr.bf16.mxu0 %v4623_v40  ;;  %2728 = vmatprep.mubr.msk.bf16.mxu1 %vm1541_vm6, %v3748_v26 }
 0x19e   : > { %v4045_v57 = vpack.c.bf16 %v1547_v38, %v1546_v3  ;;  %v2980_v32 = vunpack.i.l.bf16 %v2979_v42  ;;  %2278 = vmatpush1.bf16.msra.mxu1 %v3061_v12  ;;  %v843_v43 = vand.u32 15, %v639_v50  ;;  %v1196_v38 = vsel %vm4060_vm1, 0.0, %v3546_v60  ;;  %v3060_v50 = vld [vmem:[%s4541_s3 + $0x20] sm:$0xff]  }
 0x19f   : > { %v2994_v33 = vpop.permute.xlu0 %2993  ;;  %1816 = vmatmul.mubr.bf16.gmra.mrb[36].mxu0 %v4013_v58  ;;  %v1565_v54 = vsel %vm1541_vm6, %v3772_v52, %v2981_v56  ;;  %2279 = vmatprep.subr.bf16.mxu1 %v4623_v40  ;;  %v1212_v52 = vsel %vm4079_vm4, 0.0, %v3791_v39  ;;  %v641_v18 = vadd.s32 240, %v3325_v35  ;;  %v3066_v35 = vld [vmem:[%s4541_s3 + $0xf0] sm:$0xff]   ;;  %v1214_v8 = vsel %vm4093_vm7, 0.0, %v3844_v53 }
 0x1a0   : > { %v2996_v14 = vunpack.i.h.bf16 %v2994_v33  ;;  %v2995_v10 = vunpack.i.l.bf16 %v2994_v33  ;;  %2721 = vmatprep.mubr.msk.bf16.mxu0 %vm1541_vm6, %v3498_v51  ;;  %v1564_v48 = vsel %vm1541_vm6, %v1210_v20, %v2980_v32  ;;  %2016 = vmatpush1.bf16.msra.mxu0 %v3057_v34  ;;  %vm4134_vm8 = vcmp.eq.s32.totalorder %v843_v43, 0 }
 0x1a1   : > { %v2989_v63 = vpop.permute.xlu1 %2988  ;;  %2017 = vmatprep.subr.bf16.mxu0 %v4623_v40  ;;  %v4102_v13 = vpack.c.bf16 %v1565_v54, %v1564_v48 }
 0x1a2   : > { %v1548_v24 = vsel %vm1541_vm6, %v1194_v2, %v2995_v10  ;;  %v1549_v5 = vsel %vm1541_vm6, %v3509_v45, %v2996_v14  ;;  %v3064_v45 = vld [vmem:[%s4541_s3 + $0xe8] sm:$0xff]   ;;  %v2991_v27 = vunpack.i.h.bf16 %v2989_v63  ;;  %v2990_v21 = vunpack.i.l.bf16 %v2989_v63  ;;  %v4640_v10 = vld [vmem:[#allocation9_spill] sm:$0xff] }
 0x1a3   : > { %v3004_v19 = vpop.permute.xlu0 %3003  ;;  %v4086_v29 = vpack.c.bf16 %v1549_v5, %v1548_v24  ;;  %2280 = vmatpush1.bf16.msra.mxu1 %v3064_v45  ;;  %v1198_v2 = vsel %vm4067_vm2, 0.0, %v4640_v10  ;;  %v4643_v24 = vld [vmem:[#allocation6_spill] sm:$0xff]  ;;  %v4644_v5 = vld [vmem:[#allocation12_spill] sm:$0xff]  ;;  %v3070_v10 = vld [vmem:[%s4541_s3 + $0x50] sm:$0xff]  }
 0x1a4   : > { %v3006_v62 = vunpack.i.h.bf16 %v3004_v19  ;;  %v3005_v3 = vunpack.i.l.bf16 %v3004_v19  ;;  %v1566_v34 = vsel %vm1541_vm6, %v1212_v52, %v2990_v21  ;;  %v1567_v12 = vsel %vm1541_vm6, %v3827_v22, %v2991_v27  ;;  %2018 = vmatpush1.bf16.msra.mxu0 %v3059_v1  ;;  %2281 = vmatprep.subr.bf16.mxu1 %v4623_v40  ;;  %v3062_v1 = vld [vmem:[%s4541_s3 + $0x28] sm:$0xff]   ;;  %v3069_v45 = vld [vmem:[%s4541_s3 + $0xf8] sm:$0xff]  }
 0x1a5   : > { %v2999_v60 = vpop.permute.xlu1 %2998  ;;  %2019 = vmatprep.subr.bf16.mxu0 %v4623_v40  ;;  %1880 = vmatmul.mubr.bf16.gmra.mrb[12].mxu1 %v4027_v44  ;;  %v857_v19 = vand.u32 15, %v641_v18  ;;  %v3063_v18 = vld [vmem:[%s4541_s3 + $0x30] sm:$0xff]  }
 0x1a6   : > { %v1550_v42 = vsel %vm1541_vm6, %v1196_v38, %v3005_v3  ;;  %v1551_v33 = vsel %vm1541_vm6, %v3566_v46, %v3006_v62  ;;  %v4122_v46 = vpack.c.bf16 %v1567_v12, %v1566_v34  ;;  %v3001_v56 = vunpack.i.h.bf16 %v2999_v60  ;;  %2729 = vmatprep.mubr.msk.bf16.mxu1 %vm1541_vm6, %v4644_v5  ;;  %v4648_v12 = vld [vmem:[#allocation7_spill] sm:$0xff] }
 0x1a7   : > { %v4117_v39 = vpack.c.bf16 %v1551_v33, %v1550_v42  ;;  %v3000_v32 = vunpack.i.l.bf16 %v2999_v60  ;;  %1824 = vmatmul.mubr.bf16.gmra.mrb[40].mxu0 %v4045_v57  ;;  %2282 = vmatpush1.bf16.msra.mxu1 %v3066_v35  ;;  %v1216_v62 = vsel %vm4134_vm8, 0.0, %v3858_v30  ;;  %vm4166_vm3 = vcmp.eq.s32.totalorder %v857_v19, 0  ;;  %v3072_v30 = vld [vmem:[%s4541_s3 + $0x100] sm:$0xff]  }
 0x1a8   : > { %v3014_v47 = vpop.permute.xlu0 %3013  ;;  %2722 = vmatprep.mubr.msk.bf16.mxu0 %vm1541_vm6, %v4643_v24  ;;  %2020 = vmatpush1.bf16.msra.mxu0 %v3060_v50  ;;  %v1569_v4 = vsel %vm1541_vm6, %v3831_v28, %v3001_v56  ;;  %v3065_v50 = vld [vmem:[%s4541_s3 + $0x38] sm:$0xff]   ;;  %v3074_v56 = vld [vmem:[%s4541_s3 + $0x110] sm:$0xff]  }
 0x1a9   : > { %v3016_v14 = vunpack.i.h.bf16 %v3014_v47  ;;  %v3015_v22 = vunpack.i.l.bf16 %v3014_v47  ;;  %v1568_v63 = vsel %vm1541_vm6, %v1214_v8, %v3000_v32  ;;  %2021 = vmatprep.subr.bf16.mxu0 %v4623_v40  ;;  %2283 = vmatprep.subr.bf16.mxu1 %v4623_v40  ;;  %v4649_v32 = vld [vmem:[#allocation11_spill] sm:$0xff]  ;;  %v4650_v8 = vld [vmem:[#allocation5_spill] sm:$0xff] }
 0x1aa   : > { %v3009_v53 = vpop.permute.xlu1 %3008  ;;  %v4158_v21 = vpack.c.bf16 %v1569_v4, %v1568_v63 }
 0x1ab   : > { %v1552_v48 = vsel %vm1541_vm6, %v1198_v2, %v3015_v22  ;;  %v1553_v9 = vsel %vm1541_vm6, %v4645_v15, %v3016_v14  ;;  %v3011_v43 = vunpack.i.h.bf16 %v3009_v53  ;;  %v3010_v27 = vunpack.i.l.bf16 %v3009_v53  ;;  %2284 = vmatpush1.bf16.msra.mxu1 %v3069_v45  ;;  %v3068_v14 = vld [vmem:[%s4541_s3 + $0x48] sm:$0xff]   ;;  %v3075_v22 = vld [vmem:[%s4541_s3 + $0x118] sm:$0xff]  }
 0x1ac   : > { %v4152_v54 = vpack.c.bf16 %v1553_v9, %v1552_v48  ;;  %2022 = vmatpush1.bf16.msra.mxu0 %v3062_v1  ;;  %2285 = vmatprep.subr.bf16.mxu1 %v4623_v40  ;;  %v3071_v2 = vld [vmem:[%s4541_s3 + $0x58] sm:$0xff]  }
 0x1ad   : > { %v1570_v3 = vsel %vm1541_vm6, %v1216_v62, %v3010_v27  ;;  %v1571_v38 = vsel %vm1541_vm6, %v3873_v25, %v3011_v43  ;;  %2023 = vmatprep.subr.bf16.mxu0 %v4623_v40  ;;  %1888 = vmatmul.mubr.bf16.gmra.mrb[16].mxu1 %v4050_v31  ;;  %v1218_v25 = vsel %vm4166_vm3, 0.0, %v3889_v36  ;;  %v3073_v36 = vld [vmem:[%s4541_s3 + $0x108] sm:$0xff]  }
 0x1ae   : > { %v3019_v28 = vpop.permute.xlu1 %3018  ;;  %v4176_v42 = vpack.c.bf16 %v1571_v38, %v1570_v3  ;;  %2730 = vmatprep.mubr.msk.bf16.mxu1 %vm1541_vm6, %v3807_v11 }
 0x1af   : > { %v3021_v33 = vunpack.i.h.bf16 %v3019_v28  ;;  %v3020_v34 = vunpack.i.l.bf16 %v3019_v28  ;;  %1832 = vmatmul.mubr.bf16.gmra.mrb[44].mxu0 %v4086_v29  ;;  %2286 = vmatpush1.bf16.msra.mxu1 %v3072_v30 }
 0x1b0   : > { %2723 = vmatprep.mubr.msk.bf16.mxu0 %vm1541_vm6, %v4648_v12  ;;  %2024 = vmatpush1.bf16.msra.mxu0 %v3063_v18 }
 0x1b1   : > { %v1572_v60 = vsel %vm1541_vm6, %v1218_v25, %v3020_v34  ;;  %v1573_v47 = vsel %vm1541_vm6, %v3885_v6, %v3021_v33  ;;  %2025 = vmatprep.subr.bf16.mxu0 %v4623_v40  ;;  %2287 = vmatprep.subr.bf16.mxu1 %v4623_v40  ;;  %v3067_v6 = vld [vmem:[%s4541_s3 + $0x40] sm:$0xff]  }
 0x1b2   : > { %v4198_v35 = vpack.c.bf16 %v1573_v47, %v1572_v60 }
 0x1b3   : > { %2288 = vmatpush1.bf16.msra.mxu1 %v3073_v36 }
 0x1b4   : > { %2026 = vmatpush1.bf16.msra.mxu0 %v3065_v50  ;;  %2289 = vmatprep.subr.bf16.mxu1 %v4623_v40 }
 0x1b5   : > { %2027 = vmatprep.subr.bf16.mxu0 %v4623_v40  ;;  %1896 = vmatmul.mubr.bf16.gmra.mrb[20].mxu1 %v4102_v13 }
 0x1b6   : > { %2731 = vmatprep.mubr.msk.bf16.mxu1 %vm1541_vm6, %v3823_v23 }
 0x1b7   : > { %1840 = vmatmul.mubr.bf16.gmra.mrb[48].mxu0 %v4117_v39  ;;  %2290 = vmatpush1.bf16.msra.mxu1 %v3074_v56 }
 0x1b8   : > { %2724 = vmatprep.mubr.msk.bf16.mxu0 %vm1541_vm6, %v4649_v32  ;;  %2028 = vmatpush1.bf16.msra.mxu0 %v3067_v6 }
 0x1b9   : > { %2029 = vmatprep.subr.bf16.mxu0 %v4623_v40  ;;  %2291 = vmatprep.subr.bf16.mxu1 %v4623_v40 }
 0x1bb   : > { %2292 = vmatpush1.bf16.msra.mxu1 %v3075_v22 }
 0x1bc   : > { %2030 = vmatpush1.bf16.msra.mxu0 %v3068_v14 }
 0x1bd   : > { %2031 = vmatprep.subr.bf16.mxu0 %v4623_v40  ;;  %1904 = vmatmul.mubr.bf16.gmra.mrb[24].mxu1 %v4122_v46 }
 0x1be   : > { %2732 = vmatprep.mubr.msk.bf16.mxu1 %vm1541_vm6, %v3863_v55 }
 0x1bf   : > { %1848 = vmatmul.mubr.bf16.gmra.mrb[52].mxu0 %v4152_v54 }
 0x1c0   : > { %2043 = vmatprep.mubr.bf16.mxu0 %v4623_v40  ;;  %2032 = vmatpush1.bf16.msra.mxu0 %v3070_v10 }
 0x1c1   : > { %2033 = vmatprep.subr.bf16.mxu0 %v4623_v40 }
 0x1c4   : > { %2034 = vmatpush1.bf16.msra.mxu0 %v3071_v2 }
 0x1c5   : > { %1912 = vmatmul.mubr.bf16.gmra.mrb[28].mxu1 %v4158_v21 }
 0x1c6   : > { %2733 = vmatprep.mubr.msk.bf16.mxu1 %vm1541_vm6, %v3879_v0 }
 0x1c7   : > { %2044 = vmatmul.mubr.bf16.vlgmr.msra.gmra.mrb[56].mxu0 %v4623_v40 }
 0x1c8   : > { %2747 = vmatprep.mubr.msk.bf16.mxu0 %vm1541_vm6, %v4650_v8 }
 0x1cd   : > { %1920 = vmatmul.mubr.bf16.gmra.mrb[32].mxu1 %v4176_v42 }
 0x1ce   : > { %2734 = vmatprep.mubr.msk.bf16.mxu1 %vm1541_vm6, %v3891_v7 }
 0x1cf   : > { %2052 = vmatmul.mubr.bf16.gmra.mrb[60].mxu0 %v3974_v37 }
 0x1d0   : > { %2748 = vmatprep.mubr.msk.bf16.mxu0 %vm1541_vm6, %v3480_v61 }
 0x1d5   : > { %1928 = vmatmul.mubr.bf16.gmra.mrb[36].mxu1 %v4198_v35 }
 0x1d6   : > { %2798 = vmatprep.mubr.msk.bf16.mxu1 %vm1541_vm6, %v3480_v61  ;;  %v4651_v61 = vld [vmem:[#allocation10_spill] sm:$0xff] }
 0x1d7   : > { %2060 = vmatmul.mubr.bf16.gmra.mrb[64].mxu0 %v4013_v58 }
 0x1d8   : > { %2749 = vmatprep.mubr.msk.bf16.mxu0 %vm1541_vm6, %v3498_v51 }
 0x1dd   : > { %2302 = vmatmul.mubr.bf16.vlgmr.msra.gmra.mrb[40].mxu1 %v4013_v58 }
 0x1de   : > { %2799 = vmatprep.mubr.msk.bf16.mxu1 %vm1541_vm6, %v3498_v51 }
 0x1df   : > { %2068 = vmatmul.mubr.bf16.gmra.mrb[68].mxu0 %v4045_v57 }
 0x1e0   : > { %2750 = vmatprep.mubr.msk.bf16.mxu0 %vm1541_vm6, %v4643_v24 }
 0x1e5   : > { %2310 = vmatmul.mubr.bf16.gmra.mrb[44].mxu1 %v4045_v57 }
 0x1e6   : > { %2800 = vmatprep.mubr.msk.bf16.mxu1 %vm1541_vm6, %v4643_v24 }
 0x1e7   : > { %2076 = vmatmul.mubr.bf16.gmra.mrb[72].mxu0 %v4086_v29 }
 0x1e8   : > { %2751 = vmatprep.mubr.msk.bf16.mxu0 %vm1541_vm6, %v4648_v12 }
 0x1ed   : > { %2318 = vmatmul.mubr.bf16.gmra.mrb[48].mxu1 %v4086_v29 }
 0x1ee   : > { %2801 = vmatprep.mubr.msk.bf16.mxu1 %vm1541_vm6, %v4648_v12 }
 0x1ef   : > { %2084 = vmatmul.mubr.bf16.gmra.mrb[76].mxu0 %v4117_v39 }
 0x1f0   : > { %2752 = vmatprep.mubr.msk.bf16.mxu0 %vm1541_vm6, %v4649_v32 }
 0x1f5   : > { %2326 = vmatmul.mubr.bf16.gmra.mrb[52].mxu1 %v4117_v39 }
 0x1f6   : > { %2802 = vmatprep.mubr.msk.bf16.mxu1 %vm1541_vm6, %v4649_v32 }
 0x1f7   : > { %2092 = vmatmul.mubr.bf16.gmra.mrb[80].mxu0 %v4152_v54 }
 0x1f8   : > { %2753 = vmatprep.mubr.msk.bf16.mxu0 %vm1541_vm6, %v4651_v61 }
 0x1fd   : > { %2334 = vmatmul.mubr.bf16.gmra.mrb[56].mxu1 %v4152_v54 }
 0x1fe   : > { %2803 = vmatprep.mubr.msk.bf16.mxu1 %vm1541_vm6, %v4651_v61 }
 0x1ff   : > { %2100 = vmatmul.mubr.bf16.gmra.mrb[84].mxu0 %v3913_v17 }
 0x200   : > { %2754 = vmatprep.mubr.msk.bf16.mxu0 %vm1541_vm6, %v3687_v59 }
 0x205   : > { %2342 = vmatmul.mubr.bf16.gmra.mrb[60].mxu1 %v3913_v17 }
 0x206   : > { %2804 = vmatprep.mubr.msk.bf16.mxu1 %vm1541_vm6, %v3687_v59 }
 0x207   : > { %2108 = vmatmul.mubr.bf16.gmra.mrb[88].mxu0 %v3945_v41 }
 0x208   : > { %2755 = vmatprep.mubr.msk.bf16.mxu0 %vm1541_vm6, %v3698_v16 }
 0x20d   : > { %2350 = vmatmul.mubr.bf16.gmra.mrb[64].mxu1 %v3945_v41 }
 0x20e   : > { %2805 = vmatprep.mubr.msk.bf16.mxu1 %vm1541_vm6, %v3698_v16 }
 0x20f   : > { %2116 = vmatmul.mubr.bf16.gmra.mrb[92].mxu0 %v3983_v49 }
 0x210   : > { %2756 = vmatprep.mubr.msk.bf16.mxu0 %vm1541_vm6, %v3748_v26 }
 0x215   : > { %2358 = vmatmul.mubr.bf16.gmra.mrb[68].mxu1 %v3983_v49 }
 0x216   : > { %2806 = vmatprep.mubr.msk.bf16.mxu1 %vm1541_vm6, %v3748_v26 }
 0x217   : > { %2124 = vmatmul.mubr.bf16.gmra.mrb[96].mxu0 %v4027_v44 }
 0x218   : > { %2757 = vmatprep.mubr.msk.bf16.mxu0 %vm1541_vm6, %v4644_v5 }
 0x21d   : > { %2366 = vmatmul.mubr.bf16.gmra.mrb[72].mxu1 %v4027_v44 }
 0x21e   : > { %2807 = vmatprep.mubr.msk.bf16.mxu1 %vm1541_vm6, %v4644_v5 }
 0x21f   : > { %2132 = vmatmul.mubr.bf16.gmra.mrb[100].mxu0 %v4050_v31 }
 0x220   : > { %2758 = vmatprep.mubr.msk.bf16.mxu0 %vm1541_vm6, %v3807_v11 }
 0x225   : > { %2374 = vmatmul.mubr.bf16.gmra.mrb[76].mxu1 %v4050_v31 }
 0x226   : > { %2808 = vmatprep.mubr.msk.bf16.mxu1 %vm1541_vm6, %v3807_v11 }
 0x227   : > { %2140 = vmatmul.mubr.bf16.gmra.mrb[104].mxu0 %v4102_v13 }
 0x228   : > { %2759 = vmatprep.mubr.msk.bf16.mxu0 %vm1541_vm6, %v3823_v23 }
 0x22d   : > { %2382 = vmatmul.mubr.bf16.gmra.mrb[80].mxu1 %v4102_v13 }
 0x22e   : > { %2809 = vmatprep.mubr.msk.bf16.mxu1 %vm1541_vm6, %v3823_v23 }
 0x22f   : > { %2148 = vmatmul.mubr.bf16.gmra.mrb[108].mxu0 %v4122_v46 }
 0x230   : > { %2760 = vmatprep.mubr.msk.bf16.mxu0 %vm1541_vm6, %v3863_v55 }
 0x235   : > { %2390 = vmatmul.mubr.bf16.gmra.mrb[84].mxu1 %v4122_v46 }
 0x236   : > { %2810 = vmatprep.mubr.msk.bf16.mxu1 %vm1541_vm6, %v3863_v55 }
 0x237   : > { %2156 = vmatmul.mubr.bf16.gmra.mrb[112].mxu0 %v4158_v21 }
 0x238   : > { %2761 = vmatprep.mubr.msk.bf16.mxu0 %vm1541_vm6, %v3879_v0 }
 0x23d   : > { %2398 = vmatmul.mubr.bf16.gmra.mrb[88].mxu1 %v4158_v21 }
 0x23e   : > { %2811 = vmatprep.mubr.msk.bf16.mxu1 %vm1541_vm6, %v3879_v0 }
 0x23f   : > { %2164 = vmatmul.mubr.bf16.gmra.mrb[116].mxu0 %v4176_v42 }
 0x245   : > { %2406 = vmatmul.mubr.bf16.gmra.mrb[92].mxu1 %v4176_v42 }
 0x246   : > { %2812 = vmatprep.mubr.msk.bf16.mxu1 %vm1541_vm6, %v3891_v7 }
 0x24d   : > { %2414 = vmatmul.mubr.bf16.gmra.mrb[96].mxu1 %v4198_v35 }
 0x24e   : > { %2421 = vmatprep.mubr.bf16.mxu1 %v4623_v40 }
 0x255   : > { %2422 = vmatmul.mubr.bf16.gmra.mrb[100].mxu1 %v4623_v40 }
 0x25f   : > { %v4337_v51 = vpop.f32.mrb[0].mxu1 }
 0x260   : > { %v1859_v59 = vpop.f32.mrb[1].mxu1 }
 0x261   : > { %v4339_v16 = vpop.f32.mrb[2].mxu1 }
 0x262   : > { %v1862_v26 = vpop.f32.mrb[3].mxu1 }
 0x267   : > { %v4341_v23 = vpop.f32.mrb[4].mxu1 }
 0x268   : > { %v1867_v0 = vpop.f32.mrb[5].mxu1 }
 0x269   : > { %v4343_v41 = vpop.f32.mrb[6].mxu1 }
 0x26a   : > { %v1809_v11 = vpop.f32.mrb[32].mxu0  ;;  %v1870_v37 = vpop.f32.mrb[7].mxu1 }
 0x26b   : > { %v1811_v55 = vpop.f32.mrb[33].mxu0 }
 0x26c   : > { %v1812_v17 = vpop.f32.mrb[34].mxu0 }
 0x26d   : > { %v1814_v7 = vpop.f32.mrb[35].mxu0 }
 0x26f   : > { %v4345_v58 = vpop.f32.mrb[8].mxu1 }
 0x270   : > { %v1875_v44 = vpop.f32.mrb[9].mxu1 }
 0x271   : > { %v4347_v31 = vpop.f32.mrb[10].mxu1 }
 0x272   : > { %v1817_v49 = vpop.f32.mrb[36].mxu0  ;;  %v1878_v13 = vpop.f32.mrb[11].mxu1 }
 0x273   : > { %v1819_v40 = vpop.f32.mrb[37].mxu0 }
 0x274   : > { %v1820_v57 = vpop.f32.mrb[38].mxu0 }
 0x275   : > { %v1822_v29 = vpop.f32.mrb[39].mxu0 }
 0x278   : > { %v4349_v46 = vpop.f32.mrb[12].mxu1 }
 0x279   : > { %v1883_v24 = vpop.f32.mrb[13].mxu1 }
 0x27a   : > { %v1825_v39 = vpop.f32.mrb[40].mxu0  ;;  %v4351_v48 = vpop.f32.mrb[14].mxu1 }
 0x27b   : > { %v1827_v20 = vpop.f32.mrb[41].mxu0  ;;  %v1886_v9 = vpop.f32.mrb[15].mxu1 }
 0x27c   : > { %v1828_v5 = vpop.f32.mrb[42].mxu0 }
 0x27d   : > { %v1830_v15 = vpop.f32.mrb[43].mxu0 }
 0x280   : > { %v4353_v19 = vpop.f32.mrb[16].mxu1 }
 0x281   : > { %v1891_v1 = vpop.f32.mrb[17].mxu1 }
 0x282   : > { %v1833_v63 = vpop.f32.mrb[44].mxu0  ;;  %v4357_v54 = vpop.f32.mrb[18].mxu1 }
 0x283   : > { %v1835_v53 = vpop.f32.mrb[45].mxu0  ;;  %v1894_v43 = vpop.f32.mrb[19].mxu1 }
 0x284   : > { %v4355_v45 = vpop.f32.mrb[46].mxu0 }
 0x285   : > { %v1838_v4 = vpop.f32.mrb[47].mxu0 }
 0x288   : > { %v4361_v21 = vpop.f32.mrb[20].mxu1 }
 0x289   : > { %v1899_v3 = vpop.f32.mrb[21].mxu1 }
 0x28a   : > { %v4359_v27 = vpop.f32.mrb[48].mxu0  ;;  %v4365_v52 = vpop.f32.mrb[22].mxu1 }
 0x28b   : > { %v1843_v62 = vpop.f32.mrb[49].mxu0  ;;  %v1902_v18 = vpop.f32.mrb[23].mxu1 }
 0x28c   : > { %v4363_v38 = vpop.f32.mrb[50].mxu0 }
 0x28d   : > { %v1846_v28 = vpop.f32.mrb[51].mxu0 }
 0x290   : > { %v4369_v42 = vpop.f32.mrb[24].mxu1 }
 0x291   : > { %v1907_v34 = vpop.f32.mrb[25].mxu1 }
 0x292   : > { %v4367_v30 = vpop.f32.mrb[52].mxu0  ;;  %v4373_v12 = vpop.f32.mrb[26].mxu1 }
 0x293   : > { %v1851_v33 = vpop.f32.mrb[53].mxu0  ;;  %v1910_v47 = vpop.f32.mrb[27].mxu1 }
 0x294   : > { %v4371_v25 = vpop.f32.mrb[54].mxu0 }
 0x295   : > { %v1854_v60 = vpop.f32.mrb[55].mxu0 }
 0x298   : > { %v4375_v50 = vpop.f32.mrb[28].mxu1 }
 0x299   : > { %v1915_v35 = vpop.f32.mrb[29].mxu1 }
 0x29a   : > { %v2045_v36 = vpop.f32.mrb[56].mxu0  ;;  %v4377_v32 = vpop.f32.mrb[30].mxu1 }
 0x29b   : > { %v2046_v6 = vadd.f32 %v2045_v36, %v1809_v11  ;;  %v2047_v56 = vpop.f32.mrb[57].mxu0  ;;  %v1918_v22 = vpop.f32.mrb[31].mxu1 }
 0x29c   : > { %v2048_v14 = vpop.f32.mrb[58].mxu0 }
 0x29d   : > { %v2049_v10 = vadd.f32 %v2048_v14, %v1812_v17  ;;  %v2050_v2 = vpop.f32.mrb[59].mxu0 }
 0x2a0   : > { %v4379_v8 = vpop.f32.mrb[32].mxu1 }
 0x2a1   : > { %v1923_v59 = vpop.f32.mrb[33].mxu1 }
 0x2a2   : > { %v2053_v61 = vpop.f32.mrb[60].mxu0  ;;  %v4381_v0 = vpop.f32.mrb[34].mxu1 }
 0x2a3   : > { %v2054_v26 = vadd.f32 %v2053_v61, %v1817_v49  ;;  %v2055_v55 = vpop.f32.mrb[61].mxu0  ;;  %v1926_v37 = vpop.f32.mrb[35].mxu1 }
 0x2a4   : > { %v2056_v7 = vpop.f32.mrb[62].mxu0 }
 0x2a5   : > { %v2057_v40 = vadd.f32 %v2056_v7, %v1820_v57  ;;  %v2058_v11 = vpop.f32.mrb[63].mxu0  ;;  %v4391_v57 = vld [vmem:[%s4542_s4] ss:$0 sm:$0xff] }
 0x2a8   : > { %v4383_v44 = vpop.f32.mrb[36].mxu1 }
 0x2a9   : > { %v1931_v13 = vpop.f32.mrb[37].mxu1 }
 0x2aa   : > { %v2061_v29 = vpop.f32.mrb[64].mxu0  ;;  %v4385_v24 = vpop.f32.mrb[38].mxu1 }
 0x2ab   : > { %v2062_v17 = vadd.f32 %v2061_v29, %v1825_v39  ;;  %v2063_v20 = vpop.f32.mrb[65].mxu0  ;;  %v1934_v9 = vpop.f32.mrb[39].mxu1 }
 0x2ac   : > { %v2064_v15 = vpop.f32.mrb[66].mxu0 }
 0x2ad   : > { %v2065_v49 = vadd.f32 %v2064_v15, %v1828_v5  ;;  %v2066_v53 = vpop.f32.mrb[67].mxu0 }
 0x2b0   : > { %v2303_v1 = vpop.f32.mrb[40].mxu1 }
 0x2b1   : > { %v2430_v43 = vadd.f32 %v2303_v1, %v2046_v6  ;;  %v2305_v62 = vpop.f32.mrb[41].mxu1 }
 0x2b2   : > { %v2069_v4 = vpop.f32.mrb[68].mxu0  ;;  %v2306_v28 = vpop.f32.mrb[42].mxu1 }
 0x2b3   : > { %v2070_v39 = vadd.f32 %v2069_v4, %v1833_v63  ;;  %v2071_v3 = vpop.f32.mrb[69].mxu0  ;;  %v2469_v18 = vadd.f32 %v4391_v57, %v2430_v43  ;;  %v2431_v5 = vadd.f32 %v2306_v28, %v2049_v10  ;;  %v2308_v34 = vpop.f32.mrb[43].mxu1 }
 0x2b4   : > { %v2072_v33 = vpop.f32.mrb[70].mxu0 }
 0x2b5   : > { %v2073_v60 = vadd.f32 %v2072_v33, %v4355_v45  ;;  %v2074_v47 = vpop.f32.mrb[71].mxu0  ;;  %v2501_v36 = vmax.f32 %v2469_v18, 0.0  ;;  %v2470_v35 = vadd.f32 %v4391_v57, %v2431_v5 }
 0x2b7   : > { %2533 = vst [vmem:[%s4398_s13] sm:$0xff] %v2501_v36  ;;  %v2502_v6 = vmax.f32 %v2470_v35, 0.0 }
 0x2b8   : > { %v2311_v63 = vpop.f32.mrb[44].mxu1 }
 0x2b9   : > { %2534 = vst [vmem:[%s4398_s13 + $0x8] sm:$0xff] %v2502_v6  ;;  %v2432_v14 = vadd.f32 %v2311_v63, %v2054_v26  ;;  %v2313_v22 = vpop.f32.mrb[45].mxu1 }
 0x2ba   : > { %v2077_v56 = vpop.f32.mrb[72].mxu0  ;;  %v2314_v2 = vpop.f32.mrb[46].mxu1 }
 0x2bb   : > { %v2078_v10 = vadd.f32 %v2077_v56, %v4359_v27  ;;  %v2079_v45 = vpop.f32.mrb[73].mxu0  ;;  %v2471_v61 = vadd.f32 %v4391_v57, %v2432_v14  ;;  %v2433_v55 = vadd.f32 %v2314_v2, %v2057_v40  ;;  %v2316_v7 = vpop.f32.mrb[47].mxu1 }
 0x2bc   : > { %v2080_v59 = vpop.f32.mrb[74].mxu0 }
 0x2bd   : > { %v2081_v37 = vadd.f32 %v2080_v59, %v4363_v38  ;;  %v2082_v11 = vpop.f32.mrb[75].mxu0  ;;  %v2503_v29 = vmax.f32 %v2471_v61, 0.0  ;;  %v2472_v13 = vadd.f32 %v4391_v57, %v2433_v55 }
 0x2bf   : > { %2535 = vst [vmem:[%s4398_s13 + $0x10] sm:$0xff] %v2503_v29  ;;  %v2504_v20 = vmax.f32 %v2472_v13, 0.0 }
 0x2c0   : > { %v2319_v26 = vpop.f32.mrb[48].mxu1 }
 0x2c1   : > { %2536 = vst [vmem:[%s4398_s13 + $0x18] sm:$0xff] %v2504_v20  ;;  %v2434_v27 = vadd.f32 %v2319_v26, %v2062_v17  ;;  %v2321_v9 = vpop.f32.mrb[49].mxu1 }
 0x2c2   : > { %v2085_v15 = vpop.f32.mrb[76].mxu0  ;;  %v2322_v40 = vpop.f32.mrb[50].mxu1 }
 0x2c3   : > { %v2086_v53 = vadd.f32 %v2085_v15, %v4367_v30  ;;  %v2087_v1 = vpop.f32.mrb[77].mxu0  ;;  %v2473_v4 = vadd.f32 %v4391_v57, %v2434_v27  ;;  %v2435_v43 = vadd.f32 %v2322_v40, %v2065_v49  ;;  %v2324_v62 = vpop.f32.mrb[51].mxu1 }
 0x2c4   : > { %v2088_v38 = vpop.f32.mrb[78].mxu0 }
 0x2c5   : > { %v2089_v3 = vadd.f32 %v2088_v38, %v4371_v25  ;;  %v2090_v28 = vpop.f32.mrb[79].mxu0  ;;  %v2505_v18 = vmax.f32 %v2473_v4, 0.0  ;;  %v2474_v33 = vadd.f32 %v4391_v57, %v2435_v43 }
 0x2c7   : > { %2537 = vst [vmem:[%s4398_s13 + $0x20] sm:$0xff] %v2505_v18  ;;  %v2506_v5 = vmax.f32 %v2474_v33, 0.0 }
 0x2c8   : > { %v2327_v17 = vpop.f32.mrb[52].mxu1 }
 0x2c9   : > { %2538 = vst [vmem:[%s4398_s13 + $0x28] sm:$0xff] %v2506_v5  ;;  %v2436_v30 = vadd.f32 %v2327_v17, %v2070_v39  ;;  %v2329_v47 = vpop.f32.mrb[53].mxu1 }
 0x2ca   : > { %v2093_v34 = vpop.f32.mrb[80].mxu0  ;;  %v2330_v49 = vpop.f32.mrb[54].mxu1 }
 0x2cb   : > { %v2094_v36 = vadd.f32 %v2093_v34, %v4337_v51  ;;  %v2095_v35 = vpop.f32.mrb[81].mxu0  ;;  %v2475_v6 = vadd.f32 %v4391_v57, %v2436_v30  ;;  %v2437_v63 = vadd.f32 %v2330_v49, %v2073_v60  ;;  %v2332_v56 = vpop.f32.mrb[55].mxu1 }
 0x2cc   : > { %v2096_v25 = vpop.f32.mrb[82].mxu0 }
 0x2cd   : > { %v2097_v14 = vadd.f32 %v2096_v25, %v4339_v16  ;;  %v2098_v22 = vpop.f32.mrb[83].mxu0  ;;  %v2507_v45 = vmax.f32 %v2475_v6, 0.0  ;;  %v2476_v2 = vadd.f32 %v4391_v57, %v2437_v63 }
 0x2cf   : > { %2539 = vst [vmem:[%s4398_s13 + $0x30] sm:$0xff] %v2507_v45  ;;  %v2508_v61 = vmax.f32 %v2476_v2, 0.0 }
 0x2d0   : > { %v2335_v39 = vpop.f32.mrb[56].mxu1 }
 0x2d1   : > { %2540 = vst [vmem:[%s4398_s13 + $0x38] sm:$0xff] %v2508_v61  ;;  %v2438_v51 = vadd.f32 %v2335_v39, %v2078_v10  ;;  %v2337_v55 = vpop.f32.mrb[57].mxu1 }
 0x2d2   : > { %v2101_v59 = vpop.f32.mrb[84].mxu0  ;;  %v2338_v60 = vpop.f32.mrb[58].mxu1 }
 0x2d3   : > { %v2102_v7 = vadd.f32 %v2101_v59, %v4341_v23  ;;  %v2103_v11 = vpop.f32.mrb[85].mxu0  ;;  %v2477_v29 = vadd.f32 %v4391_v57, %v2438_v51  ;;  %v2439_v13 = vadd.f32 %v2338_v60, %v2081_v37  ;;  %v2340_v20 = vpop.f32.mrb[59].mxu1 }
 0x2d4   : > { %v2104_v16 = vpop.f32.mrb[86].mxu0 }
 0x2d5   : > { %v2105_v26 = vadd.f32 %v2104_v16, %v4343_v41  ;;  %v2106_v15 = vpop.f32.mrb[87].mxu0  ;;  %v2509_v27 = vmax.f32 %v2477_v29, 0.0  ;;  %v2478_v9 = vadd.f32 %v4391_v57, %v2439_v13 }
 0x2d7   : > { %2541 = vst [vmem:[%s4398_s13 + $0x40] sm:$0xff] %v2509_v27  ;;  %v2510_v1 = vmax.f32 %v2478_v9, 0.0 }
 0x2d8   : > { %v2343_v10 = vpop.f32.mrb[60].mxu1 }
 0x2d9   : > { %2542 = vst [vmem:[%s4398_s13 + $0x48] sm:$0xff] %v2510_v1  ;;  %v2440_v23 = vadd.f32 %v2343_v10, %v2086_v53  ;;  %v2345_v4 = vpop.f32.mrb[61].mxu1 }
 0x2da   : > { %v2109_v40 = vpop.f32.mrb[88].mxu0  ;;  %v2346_v37 = vpop.f32.mrb[62].mxu1 }
 0x2db   : > { %v2110_v38 = vadd.f32 %v2109_v40, %v4345_v58  ;;  %v2111_v43 = vpop.f32.mrb[89].mxu0  ;;  %v2479_v62 = vadd.f32 %v4391_v57, %v2440_v23  ;;  %v2441_v28 = vadd.f32 %v2346_v37, %v2089_v3  ;;  %v2348_v18 = vpop.f32.mrb[63].mxu1 }
 0x2dc   : > { %v2112_v41 = vpop.f32.mrb[90].mxu0 }
 0x2dd   : > { %v2113_v33 = vadd.f32 %v2112_v41, %v4347_v31  ;;  %v2114_v5 = vpop.f32.mrb[91].mxu0  ;;  %v2511_v17 = vmax.f32 %v2479_v62, 0.0  ;;  %v2480_v34 = vadd.f32 %v4391_v57, %v2441_v28 }
 0x2df   : > { %2543 = vst [vmem:[%s4398_s13 + $0x50] sm:$0xff] %v2511_v17  ;;  %v2512_v30 = vmax.f32 %v2480_v34, 0.0 }
 0x2e0   : > { %v2351_v53 = vpop.f32.mrb[64].mxu1 }
 0x2e1   : > { %2544 = vst [vmem:[%s4398_s13 + $0x58] sm:$0xff] %v2512_v30  ;;  %v2442_v58 = vadd.f32 %v2351_v53, %v2094_v36  ;;  %v2353_v35 = vpop.f32.mrb[65].mxu1 }
 0x2e2   : > { %v2117_v47 = vpop.f32.mrb[92].mxu0  ;;  %v2354_v3 = vpop.f32.mrb[66].mxu1 }
 0x2e3   : > { %v2118_v49 = vadd.f32 %v2117_v47, %v4349_v46  ;;  %v2119_v6 = vpop.f32.mrb[93].mxu0  ;;  %v2481_v25 = vadd.f32 %v4391_v57, %v2442_v58  ;;  %v2443_v63 = vadd.f32 %v2354_v3, %v2097_v14  ;;  %v2356_v56 = vpop.f32.mrb[67].mxu1 }
 0x2e4   : > { %v2120_v31 = vpop.f32.mrb[94].mxu0 }
 0x2e5   : > { %v2121_v22 = vadd.f32 %v2120_v31, %v4351_v48  ;;  %v2122_v45 = vpop.f32.mrb[95].mxu0  ;;  %v2513_v2 = vmax.f32 %v2481_v25, 0.0  ;;  %v2482_v61 = vadd.f32 %v4391_v57, %v2443_v63 }
 0x2e7   : > { %2545 = vst [vmem:[%s4398_s13 + $0x60] sm:$0xff] %v2513_v2  ;;  %v2514_v39 = vmax.f32 %v2482_v61, 0.0 }
 0x2e8   : > { %v2359_v36 = vpop.f32.mrb[68].mxu1 }
 0x2e9   : > { %2546 = vst [vmem:[%s4398_s13 + $0x68] sm:$0xff] %v2514_v39  ;;  %v2444_v46 = vadd.f32 %v2359_v36, %v2102_v7  ;;  %v2361_v51 = vpop.f32.mrb[69].mxu1 }
 0x2ea   : > { %v2125_v59 = vpop.f32.mrb[96].mxu0  ;;  %v2362_v14 = vpop.f32.mrb[70].mxu1 }
 0x2eb   : > { %v2126_v55 = vadd.f32 %v2125_v59, %v4353_v19  ;;  %v2127_v11 = vpop.f32.mrb[97].mxu0  ;;  %v2483_v60 = vadd.f32 %v4391_v57, %v2444_v46  ;;  %v2445_v29 = vadd.f32 %v2362_v14, %v2105_v26  ;;  %v2364_v16 = vpop.f32.mrb[71].mxu1 }
 0x2ec   : > { %v2128_v48 = vpop.f32.mrb[98].mxu0 }
 0x2ed   : > { %v2129_v13 = vadd.f32 %v2128_v48, %v4357_v54  ;;  %v2130_v20 = vpop.f32.mrb[99].mxu0  ;;  %v2515_v15 = vmax.f32 %v2483_v60, 0.0  ;;  %v2484_v27 = vadd.f32 %v4391_v57, %v2445_v29 }
 0x2ef   : > { %2547 = vst [vmem:[%s4398_s13 + $0x70] sm:$0xff] %v2515_v15  ;;  %v2516_v9 = vmax.f32 %v2484_v27, 0.0 }
 0x2f0   : > { %v2367_v7 = vpop.f32.mrb[72].mxu1 }
 0x2f1   : > { %2548 = vst [vmem:[%s4398_s13 + $0x78] sm:$0xff] %v2516_v9  ;;  %v2446_v19 = vadd.f32 %v2367_v7, %v2110_v38  ;;  %v2369_v10 = vpop.f32.mrb[73].mxu1 }
 0x2f2   : > { %v2133_v1 = vpop.f32.mrb[100].mxu0  ;;  %v2370_v26 = vpop.f32.mrb[74].mxu1 }
 0x2f3   : > { %v2134_v40 = vadd.f32 %v2133_v1, %v4361_v21  ;;  %v2135_v23 = vpop.f32.mrb[101].mxu0  ;;  %v2485_v4 = vadd.f32 %v4391_v57, %v2446_v19  ;;  %v2447_v43 = vadd.f32 %v2370_v26, %v2113_v33  ;;  %v2372_v37 = vpop.f32.mrb[75].mxu1 }
 0x2f4   : > { %v2136_v54 = vpop.f32.mrb[102].mxu0 }
 0x2f5   : > { %v2137_v62 = vadd.f32 %v2136_v54, %v4365_v52  ;;  %v2138_v41 = vpop.f32.mrb[103].mxu0  ;;  %v2517_v28 = vmax.f32 %v2485_v4, 0.0  ;;  %v2486_v18 = vadd.f32 %v4391_v57, %v2447_v43 }
 0x2f7   : > { %2549 = vst [vmem:[%s4398_s13 + $0x80] sm:$0xff] %v2517_v28  ;;  %v2518_v5 = vmax.f32 %v2486_v18, 0.0 }
 0x2f8   : > { %v2375_v38 = vpop.f32.mrb[76].mxu1 }
 0x2f9   : > { %2550 = vst [vmem:[%s4398_s13 + $0x88] sm:$0xff] %v2518_v5  ;;  %v2448_v21 = vadd.f32 %v2375_v38, %v2118_v49  ;;  %v2377_v34 = vpop.f32.mrb[77].mxu1 }
 0x2fa   : > { %v2141_v17 = vpop.f32.mrb[104].mxu0  ;;  %v2378_v33 = vpop.f32.mrb[78].mxu1 }
 0x2fb   : > { %v2142_v30 = vadd.f32 %v2141_v17, %v4369_v42  ;;  %v2143_v53 = vpop.f32.mrb[105].mxu0  ;;  %v2487_v47 = vadd.f32 %v4391_v57, %v2448_v21  ;;  %v2449_v58 = vadd.f32 %v2378_v33, %v2121_v22  ;;  %v2380_v35 = vpop.f32.mrb[79].mxu1 }
 0x2fc   : > { %v2144_v52 = vpop.f32.mrb[106].mxu0 }
 0x2fd   : > { %v2145_v6 = vadd.f32 %v2144_v52, %v4373_v12  ;;  %v2146_v3 = vpop.f32.mrb[107].mxu0  ;;  %v2519_v25 = vmax.f32 %v2487_v47, 0.0  ;;  %v2488_v31 = vadd.f32 %v4391_v57, %v2449_v58 }
 0x2ff   : > { %2551 = vst [vmem:[%s4398_s13 + $0x90] sm:$0xff] %v2519_v25  ;;  %v2520_v63 = vmax.f32 %v2488_v31, 0.0 }
 0x300   : > { %v2383_v49 = vpop.f32.mrb[80].mxu1 }
 0x301   : > { %2552 = vst [vmem:[%s4398_s13 + $0x98] sm:$0xff] %v2520_v63  ;;  %v2450_v42 = vadd.f32 %v2383_v49, %v2126_v55  ;;  %v2385_v45 = vpop.f32.mrb[81].mxu1 }
 0x302   : > { %v2149_v56 = vpop.f32.mrb[108].mxu0  ;;  %v2386_v22 = vpop.f32.mrb[82].mxu1 }
 0x303   : > { %v2150_v2 = vadd.f32 %v2149_v56, %v4375_v50  ;;  %v2151_v61 = vpop.f32.mrb[109].mxu0  ;;  %v2489_v39 = vadd.f32 %v4391_v57, %v2450_v42  ;;  %v2451_v36 = vadd.f32 %v2386_v22, %v2129_v13  ;;  %v2388_v59 = vpop.f32.mrb[83].mxu1 }
 0x304   : > { %v2152_v12 = vpop.f32.mrb[110].mxu0 }
 0x305   : > { %v2153_v46 = vadd.f32 %v2152_v12, %v4377_v32  ;;  %v2154_v51 = vpop.f32.mrb[111].mxu0  ;;  %v2521_v11 = vmax.f32 %v2489_v39, 0.0  ;;  %v2490_v14 = vadd.f32 %v4391_v57, %v2451_v36 }
 0x307   : > { %2553 = vst [vmem:[%s4398_s13 + $0xa0] sm:$0xff] %v2521_v11  ;;  %v2522_v60 = vmax.f32 %v2490_v14, 0.0 }
 0x308   : > { %v2391_v55 = vpop.f32.mrb[84].mxu1 }
 0x309   : > { %2554 = vst [vmem:[%s4398_s13 + $0xa8] sm:$0xff] %v2522_v60  ;;  %v2452_v50 = vadd.f32 %v2391_v55, %v2134_v40  ;;  %v2393_v29 = vpop.f32.mrb[85].mxu1 }
 0x30a   : > { %v2157_v48 = vpop.f32.mrb[112].mxu0  ;;  %v2394_v13 = vpop.f32.mrb[86].mxu1 }
 0x30b   : > { %v2158_v16 = vadd.f32 %v2157_v48, %v4379_v8  ;;  %v2159_v20 = vpop.f32.mrb[113].mxu0  ;;  %v2491_v15 = vadd.f32 %v4391_v57, %v2452_v50  ;;  %v2453_v27 = vadd.f32 %v2394_v13, %v2137_v62  ;;  %v2396_v9 = vpop.f32.mrb[87].mxu1 }
 0x30c   : > { %v2160_v32 = vpop.f32.mrb[114].mxu0 }
 0x30d   : > { %v2161_v7 = vadd.f32 %v2160_v32, %v4381_v0  ;;  %v2162_v1 = vpop.f32.mrb[115].mxu0  ;;  %v2523_v19 = vmax.f32 %v2491_v15, 0.0  ;;  %v2492_v10 = vadd.f32 %v4391_v57, %v2453_v27 }
 0x30f   : > { %2555 = vst [vmem:[%s4398_s13 + $0xb0] sm:$0xff] %v2523_v19  ;;  %v2524_v23 = vmax.f32 %v2492_v10, 0.0 }
 0x310   : > { %v2399_v40 = vpop.f32.mrb[88].mxu1 }
 0x311   : > { %2556 = vst [vmem:[%s4398_s13 + $0xb8] sm:$0xff] %v2524_v23  ;;  %v2454_v8 = vadd.f32 %v2399_v40, %v2142_v30  ;;  %v2401_v4 = vpop.f32.mrb[89].mxu1 }
 0x312   : > { %v2165_v26 = vpop.f32.mrb[116].mxu0  ;;  %v2402_v37 = vpop.f32.mrb[90].mxu1 }
 0x313   : > { %v2166_v54 = vadd.f32 %v2165_v26, %v4383_v44  ;;  %v2167_v43 = vpop.f32.mrb[117].mxu0  ;;  %v2493_v62 = vadd.f32 %v4391_v57, %v2454_v8  ;;  %v2455_v41 = vadd.f32 %v2402_v37, %v2145_v6  ;;  %v2404_v28 = vpop.f32.mrb[91].mxu1 }
 0x314   : > { %v2168_v0 = vpop.f32.mrb[118].mxu0 }
 0x315   : > { %v2169_v18 = vadd.f32 %v2168_v0, %v4385_v24  ;;  %v2170_v5 = vpop.f32.mrb[119].mxu0  ;;  %v2525_v38 = vmax.f32 %v2493_v62, 0.0  ;;  %v2494_v17 = vadd.f32 %v4391_v57, %v2455_v41 }
 0x317   : > { %2557 = vst [vmem:[%s4398_s13 + $0xc0] sm:$0xff] %v2525_v38  ;;  %v2526_v21 = vmax.f32 %v2494_v17, 0.0 }
 0x318   : > { %v2407_v34 = vpop.f32.mrb[92].mxu1 }
 0x319   : > { %2558 = vst [vmem:[%s4398_s13 + $0xc8] sm:$0xff] %v2526_v21  ;;  %v2456_v44 = vadd.f32 %v2407_v34, %v2150_v2  ;;  %v2409_v30 = vpop.f32.mrb[93].mxu1 }
 0x31a   : > { %v2410_v53 = vpop.f32.mrb[94].mxu1 }
 0x31b   : > { %v2495_v33 = vadd.f32 %v4391_v57, %v2456_v44  ;;  %v2457_v47 = vadd.f32 %v2410_v53, %v2153_v46  ;;  %v2412_v52 = vpop.f32.mrb[95].mxu1 }
 0x31d   : > { %v2527_v58 = vmax.f32 %v2495_v33, 0.0  ;;  %v2496_v24 = vadd.f32 %v4391_v57, %v2457_v47 }
 0x31f   : > { %2559 = vst [vmem:[%s4398_s13 + $0xd0] sm:$0xff] %v2527_v58  ;;  %v2528_v35 = vmax.f32 %v2496_v24, 0.0 }
 0x320   : > { %v2415_v6 = vpop.f32.mrb[96].mxu1 }
 0x321   : > { %2560 = vst [vmem:[%s4398_s13 + $0xd8] sm:$0xff] %v2528_v35  ;;  %v2458_v3 = vadd.f32 %v2415_v6, %v2158_v16  ;;  %v2417_v25 = vpop.f32.mrb[97].mxu1 }
 0x322   : > { %v2418_v31 = vpop.f32.mrb[98].mxu1 }
 0x323   : > { %v2497_v63 = vadd.f32 %v4391_v57, %v2458_v3  ;;  %v2459_v49 = vadd.f32 %v2418_v31, %v2161_v7  ;;  %v2420_v56 = vpop.f32.mrb[99].mxu1 }
 0x325   : > { %v2529_v42 = vmax.f32 %v2497_v63, 0.0  ;;  %v2498_v45 = vadd.f32 %v4391_v57, %v2459_v49 }
 0x327   : > { %2561 = vst [vmem:[%s4398_s13 + $0xe0] sm:$0xff] %v2529_v42  ;;  %v2530_v2 = vmax.f32 %v2498_v45, 0.0 }
 0x328   : > { %v2423_v61 = vpop.f32.mrb[100].mxu1 }
 0x329   : > { %2562 = vst [vmem:[%s4398_s13 + $0xe8] sm:$0xff] %v2530_v2  ;;  %v2460_v22 = vadd.f32 %v2423_v61, %v2166_v54  ;;  %v2425_v39 = vpop.f32.mrb[101].mxu1 }
 0x32a   : > { %v2426_v12 = vpop.f32.mrb[102].mxu1 }
 0x32b   : > { %v2499_v36 = vadd.f32 %v4391_v57, %v2460_v22  ;;  %v2461_v59 = vadd.f32 %v2426_v12, %v2169_v18  ;;  %v2428_v46 = vpop.f32.mrb[103].mxu1 }
 0x32d   : > { %v2531_v51 = vmax.f32 %v2499_v36, 0.0  ;;  %v2500_v11 = vadd.f32 %v4391_v57, %v2461_v59 }
 0x32f   : > { %2563 = vst [vmem:[%s4398_s13 + $0xf0] sm:$0xff] %v2531_v51  ;;  %v2532_v14 = vmax.f32 %v2500_v11, 0.0 }
 0x331   : > { %2564 = vst [vmem:[%s4398_s13 + $0xf8] sm:$0xff] %v2532_v14 }
 0x332   : > { %3089 = shalt.err (!%p3086_p3)
}
 0x333   : > { %s3090_s7 = scalar_lea.hbm %s4489_s23, 4096  ;;  %s3094_s10 = scalar_lea.hbm %s4543_s5, 8192 }
 0x334   : > { %p3091_p4 = scmp.ne.s32.totalorder %s4489_s23, %s3090_s7  ;;  %p3095_p9 = scmp.lt.u32.totalorder %s4489_s23, %s4543_s5 }
 0x335   : > { %p3096_p10 = scmp.lt.u32.totalorder %s3094_s10, %s3090_s7  ;;  %p3098_p12 = scmp.lt.u32.totalorder %s3090_s7, %s4489_s23 }
 0x336   : > { %p3092_p7 = pnand %p3091_p4, %p3214_p5 }
 0x337   : > { %p3097_p11 = por %p3096_p10, %p3095_p9 }
 0x338   : > { %p3093_p8 = pneg %p3092_p7 }
 0x339   : > { %p3099_p13 = por %p3098_p12, %p3097_p11 }
 0x33b   : > { %p3100_p0 = pnand %p3099_p13, %p3093_p8 }
 0x33d   : > { %3103 = shalt.err (!%p3100_p0)
}
 0x33e   : > { %s3144_s13 = smov 128   ;;  %s3145_s14 = smov 8  }
 0x33f   : > { %2898 = dma.vmem_to_hbm [thread:$0]  (%p3214_p5), %s4491_s15, 4096, %s4489_s23, %s4497_s25, %s3144_s13, %s3144_s13, %s3145_s14  }
 0x340 PF: > { %p2904_p1 = scmp.ge.s32.totalorder %s3138_s21, 2  ;;  %s2594_s16 = sand.u32 1, %s3126_s18  }
 0x341   : > { %s2595_s17 = scalar_lea.sflag [#allocation3], %s2594_s16 }
 0x342   : > { %p2901_p2 = pnand %p2904_p1, %p3218_p6 }
 0x344   : > { %3121 = dma.done.wait (!%p2901_p2), %s2595_s17, 4096  }
 0x345   : > { %3123 = vsyncadd (!%p2901_p2), %s2595_s17, 4294963200  ;;  %p15_p3 = scmp.ge.s32.totalorder %s3201_s24, 4   ;;  %s4652_s18 = smov %s3130_s19 }
 0x346   : > { %s4653_s19 = smov %s3134_s20  ;;  %s4654_s20 = smov %s3212_s27 }
 0x347   : > { %s4655_s21 = smov %s3201_s24  ;;  %17 = sbr.rel (!%p15_p3) target bundleno = 3 (0x3), region = 77 }
 0x34e   :  { %2600 = vsyncpa [#allocation3], 1 }
 0x34f   :  { %2602 = vsyncpa [#allocation3 + $0x1], 1 }

</bundles_post_ra>
